<compile_context>
chip_gen: v7x
topology: tpu7x:2x2x1
jax: 0.10.0
libtpu: 0.0.40
codegen_flags: <defaults>
</compile_context>

<pallas_src>
import jax
import jax.numpy as jnp
from jax.experimental import pallas as pl
from jax.experimental.pallas import tpu as pltpu

f32 = jnp.float32
bf16 = jnp.bfloat16


# ----------------------------- fused forward --------------------------------

def nnmodel2_forward(params, x, src, dst, edge_attr, batch, num_graphs):
    N, Fin = x.shape
    E, De = edge_attr.shape
    H = params["conv1"]["root"].shape[1]
    Hh = params["lin1"]["w"].shape[1]
    B = int(num_graphs)

    # ---- host-side one-time packing (constant folding / index prep) ----
    def pack_conv(cp, fin):
        # nn_w: (De, fin*H), flat column i*H + o (matches PyG .view(-1, fin, H)).
        # Wcat column blocks:  [d*H:(d+1)*H], d<De : ea-weighted edge-net terms
        #                      [De*H:(De+1)*H]     : nn-bias term (weight == 1)
        #                      [(De+1)*H:(De+2)*H] : root term (root matmul folded in)
        a = cp["nn_w"].reshape(De, fin, H).transpose(1, 0, 2).reshape(fin, De * H)
        bmat = cp["nn_b"].reshape(fin, H)
        wcat = jnp.concatenate([a, bmat, cp["root"]], axis=1).astype(bf16)
        return wcat, cp["bias"].reshape(1, H).astype(f32)

    w1cat, bias1 = pack_conv(params["conv1"], Fin)
    w2cat, bias2 = pack_conv(params["conv2"], H)
    l1w = params["lin1"]["w"].astype(bf16)
    l1b = params["lin1"]["b"].reshape(1, Hh).astype(f32)
    l2w = params["lin2"]["w"].astype(bf16)
    l2b = params["lin2"]["b"].reshape(1, 1).astype(f32)

    # ea_aug: extra all-ones column so the nn-bias block rides the same
    # ea-weighted gather matmuls as the De edge-attribute blocks.
    ea_aug = jnp.concatenate([edge_attr.astype(f32), jnp.ones((E, 1), f32)], axis=1)
    # Host-precomputed 1/|graph| (no cnt scratch, no in-kernel divide).
    inv_cnt = (1.0 / jnp.maximum(jnp.bincount(batch.astype(jnp.int32), length=B), 1)
               ).astype(f32).reshape(B, 1)

    src_col = src.astype(jnp.int32).reshape(E, 1)        # lane-broadcast -> (E, N) mask
    dst_row = dst.astype(jnp.int32).reshape(1, E)        # sublane-broadcast -> (N, E) one-hot
    batch_row = batch.astype(jnp.int32).reshape(1, N)    # sublane-broadcast -> (B, N) one-hot

    def kernel(src_ref, dst_ref, batch_ref, invc_ref,
               x_ref, ea_ref,
               w1_ref, b1_ref, w2_ref, b2_ref,
               l1w_ref, l1b_ref, l2w_ref, l2b_ref,
               out_ref, t_ref):

        # ---- selection masks, built once; the whole kernel has zero serial loops ----
        src_mask = (jax.lax.broadcasted_iota(jnp.int32, (E, N), 1)
                    == src_ref[...])                                      # (E, N) bool
        dst_oh = jnp.where(jax.lax.broadcasted_iota(jnp.int32, (N, E), 0)
                           == dst_ref[...], 1.0, 0.0).astype(bf16)        # (N, E)
        pool_oh = jnp.where(jax.lax.broadcasted_iota(jnp.int32, (B, N), 0)
                            == batch_ref[...], 1.0, 0.0).astype(bf16)     # (B, N)
        ea = ea_ref[...]                                                  # (E, De+1) f32

        def conv_layer(h_nodes, w_ref, bias_ref):
            # Single MXU pass over nodes: edge-net products + nn-bias term + root term.
            t_ref[...] = jnp.dot(h_nodes.astype(bf16), w_ref[...],
                                 preferred_element_type=f32).astype(bf16)  # (N,(De+2)*H)
            # Fused gather + ea-MAC:
            #   msg[e] = sum_d ea_aug[e,d] * T[src[e], d*H:(d+1)*H]
            # expressed as (De+1) ea-weighted one-hot MXU matmuls; only the (E, H)
            # message block is ever materialized (no wide gathered buffer).
            msg = None
            for d in range(De + 1):                                        # small static unroll
                gd = jnp.where(src_mask, ea[:, d:d + 1], 0.0).astype(bf16)  # (E, N)
                part = jnp.dot(gd, t_ref[:, d * H:(d + 1) * H],
                               preferred_element_type=f32)                  # (E, H)
                msg = part if msg is None else msg + part
            # Scatter-add over destinations as one one-hot MXU matmul.
            agg = jnp.dot(dst_oh, msg.astype(bf16), preferred_element_type=f32)  # (N, H)
            root = t_ref[:, (De + 1) * H:].astype(f32)
            return agg + root + bias_ref[...]

        h1 = jnp.maximum(conv_layer(x_ref[...], w1_ref, b1_ref), 0.0)
        h2 = conv_layer(h1, w2_ref, b2_ref)                # no relu after conv2

        # global_mean_pool: (B, N) one-hot matmul + host-precomputed 1/count.
        mean = (jnp.dot(pool_oh, h2.astype(bf16), preferred_element_type=f32)
                * invc_ref[...])                                           # (B, H)

        # TODO(synk): training-mode dropout (p=0.5) not implemented; eval = identity.
        z = jnp.dot(mean.astype(bf16), l1w_ref[...],
                    preferred_element_type=f32) + l1b_ref[...]
        z = jnp.maximum(z, 0.0)
        z = jnp.dot(z.astype(bf16), l2w_ref[...],
                    preferred_element_type=f32) + l2b_ref[...]
        out_ref[...] = 1.0 / (1.0 + jnp.exp(-z))

    operands = (src_col, dst_row, batch_row, inv_cnt, x.astype(f32), ea_aug,
                w1cat, bias1, w2cat, bias2, l1w, l1b, l2w, l2b)

    # VMEM budget derived from the actual footprint + hardware capacity.
    need = sum(int(a.size) * a.dtype.itemsize for a in operands)
    need += N * (De + 2) * H * 2 + B * 4                  # bf16 T scratch + output
    try:
        cap = int(pltpu.get_tpu_info().vmem_capacity_bytes)
    except Exception:
        cap = 64 * 1024 * 1024                            # conservative (v7x per-core)
    vmem_limit = int(min(cap // 2, max(32 * 1024 * 1024, 8 * need)))

    vmem = pl.BlockSpec(memory_space=pltpu.MemorySpace.VMEM)

    # TODO(synk): at large N/E, tile edges/nodes with a parallel grid (uses both v7x
    # TensorCores) and replace the dense one-hot matmuls with dst-sorted segment sums
    # / DMA gathers; dense selection matrices are only sensible at these small sizes.
    return pl.pallas_call(
        kernel,
        out_shape=jax.ShapeDtypeStruct((B, 1), f32),
        in_specs=[vmem] * len(operands),
        out_specs=vmem,
        scratch_shapes=[pltpu.VMEM((N, (De + 2) * H), bf16)],   # per-node T (bf16)
        compiler_params=pltpu.CompilerParams(vmem_limit_bytes=vmem_limit),
    )(*operands)


# --------------------------- pure-JAX reference ------------------------------

def reference_forward(params, x, src, dst, edge_attr, batch, num_graphs):
    N = x.shape[0]
    H = params["conv1"]["root"].shape[1]

    def conv(h, cp):
        fin = h.shape[1]
        w = (edge_attr @ cp["nn_w"] + cp["nn_b"]).reshape(-1, fin, H)   # (E, fin, H)
        msg = jnp.einsum("ef,efh->eh", h[src], w)
        agg = jnp.zeros((N, H), jnp.float32).at[dst].add(msg)
        return agg + h @ cp["root"] + cp["bias"]

    h = jax.nn.relu(conv(x, params["conv1"]))
    h = conv(h, params["conv2"])
    sums = jnp.zeros((num_graphs, H), jnp.float32).at[batch].add(h)
    cnts = jnp.zeros((num_graphs, 1), jnp.float32).at[batch].add(1.0)
    mean = sums / jnp.maximum(cnts, 1.0)
    z = jax.nn.relu(mean @ params["lin1"]["w"] + params["lin1"]["b"])
    z = z @ params["lin2"]["w"] + params["lin2"]["b"]
    return jax.nn.sigmoid(z)


# --------------------------- deterministic params ----------------------------

def init_params(key, node_dim=16, edge_dim=8, hidden=128):
    ks = iter(jax.random.split(key, 16))

    def nrm(shape, scale=0.05):
        return (scale * jax.random.normal(next(ks), shape)).astype(jnp.float32)

    def conv(fin):
        return dict(nn_w=nrm((edge_dim, fin * hidden)), nn_b=nrm((fin * hidden,)),
                    root=nrm((fin, hidden)), bias=nrm((hidden,)))

    return dict(
        conv1=conv(node_dim),
        conv2=conv(hidden),
        lin1=dict(w=nrm((hidden, hidden // 2)), b=nrm((hidden // 2,))),
        lin2=dict(w=nrm((hidden // 2, 1)), b=nrm((1,))),
    )


# --------------------------- main --------------------------------------------

if __name__ == "__main__":
    key = jax.random.PRNGKey(0)
    k_param, k_x, k_ea, k_s0, k_d0, k_s1, k_d1 = jax.random.split(key, 7)

    NODE_DIM, EDGE_DIM, HIDDEN = 16, 8, 128      # small stand-ins for 64 / 32 / 256
    N, E, B = 16, 32, 2                          # 2 graphs of 8 nodes, 16 edges each

    params = init_params(k_param, NODE_DIM, EDGE_DIM, HIDDEN)

    x = jax.random.normal(k_x, (N, NODE_DIM), dtype=jnp.float32)
    edge_attr = jax.random.normal(k_ea, (E, EDGE_DIM), dtype=jnp.float32)
    # edges stay within their own graph
    src = jnp.concatenate([jax.random.randint(k_s0, (E // 2,), 0, N // 2),
                           jax.random.randint(k_s1, (E // 2,), N // 2, N)]).astype(jnp.int32)
    dst = jnp.concatenate([jax.random.randint(k_d0, (E // 2,), 0, N // 2),
                           jax.random.randint(k_d1, (E // 2,), N // 2, N)]).astype(jnp.int32)
    batch = jnp.concatenate([jnp.zeros((N // 2,), jnp.int32),
                             jnp.ones((N // 2,), jnp.int32)])

    out = nnmodel2_forward(params, x, src, dst, edge_attr, batch, B)
    out = jax.block_until_ready(out)
    ref = jax.block_until_ready(reference_forward(params, x, src, dst, edge_attr, batch, B))

    assert out.shape == (B, 1)
    assert bool(jnp.all(jnp.isfinite(out)))
    assert bool(jnp.all((out > 0.0) & (out < 1.0)))
    assert float(jnp.max(jnp.abs(out - ref))) < 5e-2   # bf16-MXU vs f32 reference
    print("KERNEL_OK")
</pallas_src>

<mosaic_0001>
module attributes {stable_mosaic.version = 11 : i64} {
  func.func @kernel(%arg0: memref<32x1xi32, #tpu.memory_space<vmem>>, %arg1: memref<1x32xi32, #tpu.memory_space<vmem>>, %arg2: memref<1x16xi32, #tpu.memory_space<vmem>>, %arg3: memref<2x1xf32, #tpu.memory_space<vmem>>, %arg4: memref<16x16xf32, #tpu.memory_space<vmem>>, %arg5: memref<32x9xf32, #tpu.memory_space<vmem>>, %arg6: memref<16x1280xbf16, #tpu.memory_space<vmem>>, %arg7: memref<1x128xf32, #tpu.memory_space<vmem>>, %arg8: memref<128x1280xbf16, #tpu.memory_space<vmem>>, %arg9: memref<1x128xf32, #tpu.memory_space<vmem>>, %arg10: memref<128x64xbf16, #tpu.memory_space<vmem>>, %arg11: memref<1x64xf32, #tpu.memory_space<vmem>>, %arg12: memref<64x1xbf16, #tpu.memory_space<vmem>>, %arg13: memref<1x1xf32, #tpu.memory_space<vmem>>, %arg14: memref<2x1xf32, #tpu.memory_space<vmem>>, %arg15: memref<16x1280xbf16, #tpu.memory_space<vmem>>) attributes {dimension_semantics = [], scalar_prefetch = 0 : i64, scratch_operands = 1 : i64, tpu.core_type = #tpu.core_type<tc>} {
    %0 = tpu.iota {dimensions = array<i32: 1>} : vector<32x16xi32>
    %c0 = arith.constant 0 : index
    %c0_0 = arith.constant 0 : index
    %1 = vector.load %arg0[%c0, %c0_0] : memref<32x1xi32, #tpu.memory_space<vmem>>, vector<32x1xi32>
    %2 = vector.broadcast %1 : vector<32x1xi32> to vector<32x16xi32>
    %3 = arith.cmpi eq, %0, %2 : vector<32x16xi32>
    %4 = tpu.iota {dimensions = array<i32: 0>} : vector<16x32xi32>
    %c0_1 = arith.constant 0 : index
    %c0_2 = arith.constant 0 : index
    %5 = vector.load %arg1[%c0_1, %c0_2] : memref<1x32xi32, #tpu.memory_space<vmem>>, vector<1x32xi32>
    %6 = vector.broadcast %5 : vector<1x32xi32> to vector<16x32xi32>
    %7 = arith.cmpi eq, %4, %6 : vector<16x32xi32>
    %cst = arith.constant 1.000000e+00 : f32
    %cst_3 = arith.constant 0.000000e+00 : f32
    %8 = vector.broadcast %cst : f32 to vector<16x32xf32>
    %9 = vector.broadcast %cst_3 : f32 to vector<16x32xf32>
    %10 = arith.select %7, %8, %9 : vector<16x32xi1>, vector<16x32xf32>
    %11 = arith.truncf %10 : vector<16x32xf32> to vector<16x32xbf16>
    %12 = tpu.iota {dimensions = array<i32: 0>} : vector<2x16xi32>
    %c0_4 = arith.constant 0 : index
    %c0_5 = arith.constant 0 : index
    %13 = vector.load %arg2[%c0_4, %c0_5] : memref<1x16xi32, #tpu.memory_space<vmem>>, vector<1x16xi32>
    %14 = vector.broadcast %13 : vector<1x16xi32> to vector<2x16xi32>
    %15 = arith.cmpi eq, %12, %14 : vector<2x16xi32>
    %cst_6 = arith.constant 1.000000e+00 : f32
    %cst_7 = arith.constant 0.000000e+00 : f32
    %16 = vector.broadcast %cst_6 : f32 to vector<2x16xf32>
    %17 = vector.broadcast %cst_7 : f32 to vector<2x16xf32>
    %18 = arith.select %15, %16, %17 : vector<2x16xi1>, vector<2x16xf32>
    %19 = arith.truncf %18 : vector<2x16xf32> to vector<2x16xbf16>
    %c0_8 = arith.constant 0 : index
    %c0_9 = arith.constant 0 : index
    %20 = vector.load %arg5[%c0_8, %c0_9] : memref<32x9xf32, #tpu.memory_space<vmem>>, vector<32x9xf32>
    %c0_10 = arith.constant 0 : index
    %c0_11 = arith.constant 0 : index
    %21 = vector.load %arg4[%c0_10, %c0_11] : memref<16x16xf32, #tpu.memory_space<vmem>>, vector<16x16xf32>
    %22 = arith.truncf %21 : vector<16x16xf32> to vector<16x16xbf16>
    %c0_12 = arith.constant 0 : index
    %c0_13 = arith.constant 0 : index
    %23 = vector.load %arg6[%c0_12, %c0_13] : memref<16x1280xbf16, #tpu.memory_space<vmem>>, vector<16x1280xbf16>
    %cst_14 = arith.constant dense<0.000000e+00> : vector<16x1280xf32>
    %24 = tpu.matmul %22, %23, %cst_14 {dimension_numbers = #tpu.dot_dimension_numbers<[1], [0], [0], [1], [0, 0, 1, 1], [], []>} : vector<16x16xbf16>, vector<16x1280xbf16>, vector<16x1280xf32> -> vector<16x1280xf32>
    %25 = arith.truncf %24 : vector<16x1280xf32> to vector<16x1280xbf16>
    %c0_15 = arith.constant 0 : index
    %c0_16 = arith.constant 0 : index
    %26 = vector.load %arg15[%c0_15, %c0_16] : memref<16x1280xbf16, #tpu.memory_space<vmem>>, vector<16x1280xbf16>
    tpu.vector_store %arg15[%c0_15, %c0_16], %25 {strides = array<i32>} : memref<16x1280xbf16, #tpu.memory_space<vmem>>, vector<16x1280xbf16>,
    %27 = vector.extract_strided_slice %20 {offsets = [0, 0], sizes = [32, 1], strides = [1, 1]} : vector<32x9xf32> to vector<32x1xf32>
    %cst_17 = arith.constant 0.000000e+00 : f32
    %28 = vector.shape_cast %27 : vector<32x1xf32> to vector<32x1xf32>
    %29 = vector.broadcast %28 : vector<32x1xf32> to vector<32x16xf32>
    %30 = vector.broadcast %cst_17 : f32 to vector<32x16xf32>
    %31 = arith.select %3, %29, %30 : vector<32x16xi1>, vector<32x16xf32>
    %32 = arith.truncf %31 : vector<32x16xf32> to vector<32x16xbf16>
    %c0_18 = arith.constant 0 : index
    %c0_19 = arith.constant 0 : index
    %33 = vector.load %arg15[%c0_18, %c0_19] : memref<16x1280xbf16, #tpu.memory_space<vmem>>, vector<16x128xbf16>
    %cst_20 = arith.constant dense<0.000000e+00> : vector<32x128xf32>
    %34 = tpu.matmul %32, %33, %cst_20 {dimension_numbers = #tpu.dot_dimension_numbers<[1], [0], [0], [1], [0, 0, 1, 1], [], []>} : vector<32x16xbf16>, vector<16x128xbf16>, vector<32x128xf32> -> vector<32x128xf32>
    %35 = vector.extract_strided_slice %20 {offsets = [0, 1], sizes = [32, 1], strides = [1, 1]} : vector<32x9xf32> to vector<32x1xf32>
    %cst_21 = arith.constant 0.000000e+00 : f32
    %36 = vector.shape_cast %35 : vector<32x1xf32> to vector<32x1xf32>
    %37 = vector.broadcast %36 : vector<32x1xf32> to vector<32x16xf32>
    %38 = vector.broadcast %cst_21 : f32 to vector<32x16xf32>
    %39 = arith.select %3, %37, %38 : vector<32x16xi1>, vector<32x16xf32>
    %40 = arith.truncf %39 : vector<32x16xf32> to vector<32x16xbf16>
    %c0_22 = arith.constant 0 : index
    %c128 = arith.constant 128 : index
    %41 = vector.load %arg15[%c0_22, %c128] : memref<16x1280xbf16, #tpu.memory_space<vmem>>, vector<16x128xbf16>
    %cst_23 = arith.constant dense<0.000000e+00> : vector<32x128xf32>
    %42 = tpu.matmul %40, %41, %cst_23 {dimension_numbers = #tpu.dot_dimension_numbers<[1], [0], [0], [1], [0, 0, 1, 1], [], []>} : vector<32x16xbf16>, vector<16x128xbf16>, vector<32x128xf32> -> vector<32x128xf32>
    %43 = arith.addf %34, %42 : vector<32x128xf32>
    %44 = vector.extract_strided_slice %20 {offsets = [0, 2], sizes = [32, 1], strides = [1, 1]} : vector<32x9xf32> to vector<32x1xf32>
    %cst_24 = arith.constant 0.000000e+00 : f32
    %45 = vector.shape_cast %44 : vector<32x1xf32> to vector<32x1xf32>
    %46 = vector.broadcast %45 : vector<32x1xf32> to vector<32x16xf32>
    %47 = vector.broadcast %cst_24 : f32 to vector<32x16xf32>
    %48 = arith.select %3, %46, %47 : vector<32x16xi1>, vector<32x16xf32>
    %49 = arith.truncf %48 : vector<32x16xf32> to vector<32x16xbf16>
    %c0_25 = arith.constant 0 : index
    %c256 = arith.constant 256 : index
    %50 = vector.load %arg15[%c0_25, %c256] : memref<16x1280xbf16, #tpu.memory_space<vmem>>, vector<16x128xbf16>
    %cst_26 = arith.constant dense<0.000000e+00> : vector<32x128xf32>
    %51 = tpu.matmul %49, %50, %cst_26 {dimension_numbers = #tpu.dot_dimension_numbers<[1], [0], [0], [1], [0, 0, 1, 1], [], []>} : vector<32x16xbf16>, vector<16x128xbf16>, vector<32x128xf32> -> vector<32x128xf32>
    %52 = arith.addf %43, %51 : vector<32x128xf32>
    %53 = vector.extract_strided_slice %20 {offsets = [0, 3], sizes = [32, 1], strides = [1, 1]} : vector<32x9xf32> to vector<32x1xf32>
    %cst_27 = arith.constant 0.000000e+00 : f32
    %54 = vector.shape_cast %53 : vector<32x1xf32> to vector<32x1xf32>
    %55 = vector.broadcast %54 : vector<32x1xf32> to vector<32x16xf32>
    %56 = vector.broadcast %cst_27 : f32 to vector<32x16xf32>
    %57 = arith.select %3, %55, %56 : vector<32x16xi1>, vector<32x16xf32>
    %58 = arith.truncf %57 : vector<32x16xf32> to vector<32x16xbf16>
    %c0_28 = arith.constant 0 : index
    %c384 = arith.constant 384 : index
    %59 = vector.load %arg15[%c0_28, %c384] : memref<16x1280xbf16, #tpu.memory_space<vmem>>, vector<16x128xbf16>
    %cst_29 = arith.constant dense<0.000000e+00> : vector<32x128xf32>
    %60 = tpu.matmul %58, %59, %cst_29 {dimension_numbers = #tpu.dot_dimension_numbers<[1], [0], [0], [1], [0, 0, 1, 1], [], []>} : vector<32x16xbf16>, vector<16x128xbf16>, vector<32x128xf32> -> vector<32x128xf32>
    %61 = arith.addf %52, %60 : vector<32x128xf32>
    %62 = vector.extract_strided_slice %20 {offsets = [0, 4], sizes = [32, 1], strides = [1, 1]} : vector<32x9xf32> to vector<32x1xf32>
    %cst_30 = arith.constant 0.000000e+00 : f32
    %63 = vector.shape_cast %62 : vector<32x1xf32> to vector<32x1xf32>
    %64 = vector.broadcast %63 : vector<32x1xf32> to vector<32x16xf32>
    %65 = vector.broadcast %cst_30 : f32 to vector<32x16xf32>
    %66 = arith.select %3, %64, %65 : vector<32x16xi1>, vector<32x16xf32>
    %67 = arith.truncf %66 : vector<32x16xf32> to vector<32x16xbf16>
    %c0_31 = arith.constant 0 : index
    %c512 = arith.constant 512 : index
    %68 = vector.load %arg15[%c0_31, %c512] : memref<16x1280xbf16, #tpu.memory_space<vmem>>, vector<16x128xbf16>
    %cst_32 = arith.constant dense<0.000000e+00> : vector<32x128xf32>
    %69 = tpu.matmul %67, %68, %cst_32 {dimension_numbers = #tpu.dot_dimension_numbers<[1], [0], [0], [1], [0, 0, 1, 1], [], []>} : vector<32x16xbf16>, vector<16x128xbf16>, vector<32x128xf32> -> vector<32x128xf32>
    %70 = arith.addf %61, %69 : vector<32x128xf32>
    %71 = vector.extract_strided_slice %20 {offsets = [0, 5], sizes = [32, 1], strides = [1, 1]} : vector<32x9xf32> to vector<32x1xf32>
    %cst_33 = arith.constant 0.000000e+00 : f32
    %72 = vector.shape_cast %71 : vector<32x1xf32> to vector<32x1xf32>
    %73 = vector.broadcast %72 : vector<32x1xf32> to vector<32x16xf32>
    %74 = vector.broadcast %cst_33 : f32 to vector<32x16xf32>
    %75 = arith.select %3, %73, %74 : vector<32x16xi1>, vector<32x16xf32>
    %76 = arith.truncf %75 : vector<32x16xf32> to vector<32x16xbf16>
    %c0_34 = arith.constant 0 : index
    %c640 = arith.constant 640 : index
    %77 = vector.load %arg15[%c0_34, %c640] : memref<16x1280xbf16, #tpu.memory_space<vmem>>, vector<16x128xbf16>
    %cst_35 = arith.constant dense<0.000000e+00> : vector<32x128xf32>
    %78 = tpu.matmul %76, %77, %cst_35 {dimension_numbers = #tpu.dot_dimension_numbers<[1], [0], [0], [1], [0, 0, 1, 1], [], []>} : vector<32x16xbf16>, vector<16x128xbf16>, vector<32x128xf32> -> vector<32x128xf32>
    %79 = arith.addf %70, %78 : vector<32x128xf32>
    %80 = vector.extract_strided_slice %20 {offsets = [0, 6], sizes = [32, 1], strides = [1, 1]} : vector<32x9xf32> to vector<32x1xf32>
    %cst_36 = arith.constant 0.000000e+00 : f32
    %81 = vector.shape_cast %80 : vector<32x1xf32> to vector<32x1xf32>
    %82 = vector.broadcast %81 : vector<32x1xf32> to vector<32x16xf32>
    %83 = vector.broadcast %cst_36 : f32 to vector<32x16xf32>
    %84 = arith.select %3, %82, %83 : vector<32x16xi1>, vector<32x16xf32>
    %85 = arith.truncf %84 : vector<32x16xf32> to vector<32x16xbf16>
    %c0_37 = arith.constant 0 : index
    %c768 = arith.constant 768 : index
    %86 = vector.load %arg15[%c0_37, %c768] : memref<16x1280xbf16, #tpu.memory_space<vmem>>, vector<16x128xbf16>
    %cst_38 = arith.constant dense<0.000000e+00> : vector<32x128xf32>
    %87 = tpu.matmul %85, %86, %cst_38 {dimension_numbers = #tpu.dot_dimension_numbers<[1], [0], [0], [1], [0, 0, 1, 1], [], []>} : vector<32x16xbf16>, vector<16x128xbf16>, vector<32x128xf32> -> vector<32x128xf32>
    %88 = arith.addf %79, %87 : vector<32x128xf32>
    %89 = vector.extract_strided_slice %20 {offsets = [0, 7], sizes = [32, 1], strides = [1, 1]} : vector<32x9xf32> to vector<32x1xf32>
    %cst_39 = arith.constant 0.000000e+00 : f32
    %90 = vector.shape_cast %89 : vector<32x1xf32> to vector<32x1xf32>
    %91 = vector.broadcast %90 : vector<32x1xf32> to vector<32x16xf32>
    %92 = vector.broadcast %cst_39 : f32 to vector<32x16xf32>
    %93 = arith.select %3, %91, %92 : vector<32x16xi1>, vector<32x16xf32>
    %94 = arith.truncf %93 : vector<32x16xf32> to vector<32x16xbf16>
    %c0_40 = arith.constant 0 : index
    %c896 = arith.constant 896 : index
    %95 = vector.load %arg15[%c0_40, %c896] : memref<16x1280xbf16, #tpu.memory_space<vmem>>, vector<16x128xbf16>
    %cst_41 = arith.constant dense<0.000000e+00> : vector<32x128xf32>
    %96 = tpu.matmul %94, %95, %cst_41 {dimension_numbers = #tpu.dot_dimension_numbers<[1], [0], [0], [1], [0, 0, 1, 1], [], []>} : vector<32x16xbf16>, vector<16x128xbf16>, vector<32x128xf32> -> vector<32x128xf32>
    %97 = arith.addf %88, %96 : vector<32x128xf32>
    %98 = vector.extract_strided_slice %20 {offsets = [0, 8], sizes = [32, 1], strides = [1, 1]} : vector<32x9xf32> to vector<32x1xf32>
    %cst_42 = arith.constant 0.000000e+00 : f32
    %99 = vector.shape_cast %98 : vector<32x1xf32> to vector<32x1xf32>
    %100 = vector.broadcast %99 : vector<32x1xf32> to vector<32x16xf32>
    %101 = vector.broadcast %cst_42 : f32 to vector<32x16xf32>
    %102 = arith.select %3, %100, %101 : vector<32x16xi1>, vector<32x16xf32>
    %103 = arith.truncf %102 : vector<32x16xf32> to vector<32x16xbf16>
    %c0_43 = arith.constant 0 : index
    %c1024 = arith.constant 1024 : index
    %104 = vector.load %arg15[%c0_43, %c1024] : memref<16x1280xbf16, #tpu.memory_space<vmem>>, vector<16x128xbf16>
    %cst_44 = arith.constant dense<0.000000e+00> : vector<32x128xf32>
    %105 = tpu.matmul %103, %104, %cst_44 {dimension_numbers = #tpu.dot_dimension_numbers<[1], [0], [0], [1], [0, 0, 1, 1], [], []>} : vector<32x16xbf16>, vector<16x128xbf16>, vector<32x128xf32> -> vector<32x128xf32>
    %106 = arith.addf %97, %105 : vector<32x128xf32>
    %107 = arith.truncf %106 : vector<32x128xf32> to vector<32x128xbf16>
    %cst_45 = arith.constant dense<0.000000e+00> : vector<16x128xf32>
    %108 = tpu.matmul %11, %107, %cst_45 {dimension_numbers = #tpu.dot_dimension_numbers<[1], [0], [0], [1], [0, 0, 1, 1], [], []>} : vector<16x32xbf16>, vector<32x128xbf16>, vector<16x128xf32> -> vector<16x128xf32>
    %c0_46 = arith.constant 0 : index
    %c1152 = arith.constant 1152 : index
    %109 = vector.load %arg15[%c0_46, %c1152] : memref<16x1280xbf16, #tpu.memory_space<vmem>>, vector<16x128xbf16>
    %110 = arith.extf %109 : vector<16x128xbf16> to vector<16x128xf32>
    %111 = arith.addf %108, %110 : vector<16x128xf32>
    %c0_47 = arith.constant 0 : index
    %c0_48 = arith.constant 0 : index
    %112 = vector.load %arg7[%c0_47, %c0_48] : memref<1x128xf32, #tpu.memory_space<vmem>>, vector<1x128xf32>
    %113 = vector.broadcast %112 : vector<1x128xf32> to vector<16x128xf32>
    %114 = arith.addf %111, %113 : vector<16x128xf32>
    %cst_49 = arith.constant 0.000000e+00 : f32
    %115 = vector.broadcast %cst_49 : f32 to vector<16x128xf32>
    %116 = arith.maximumf %114, %115 : vector<16x128xf32>
    %117 = arith.truncf %116 : vector<16x128xf32> to vector<16x128xbf16>
    %c0_50 = arith.constant 0 : index
    %c0_51 = arith.constant 0 : index
    %118 = vector.load %arg8[%c0_50, %c0_51] : memref<128x1280xbf16, #tpu.memory_space<vmem>>, vector<128x1280xbf16>
    %cst_52 = arith.constant dense<0.000000e+00> : vector<16x1280xf32>
    %119 = tpu.matmul %117, %118, %cst_52 {dimension_numbers = #tpu.dot_dimension_numbers<[1], [0], [0], [1], [0, 0, 1, 1], [], []>} : vector<16x128xbf16>, vector<128x1280xbf16>, vector<16x1280xf32> -> vector<16x1280xf32>
    %120 = arith.truncf %119 : vector<16x1280xf32> to vector<16x1280xbf16>
    %c0_53 = arith.constant 0 : index
    %c0_54 = arith.constant 0 : index
    %121 = vector.load %arg15[%c0_53, %c0_54] : memref<16x1280xbf16, #tpu.memory_space<vmem>>, vector<16x1280xbf16>
    tpu.vector_store %arg15[%c0_53, %c0_54], %120 {strides = array<i32>} : memref<16x1280xbf16, #tpu.memory_space<vmem>>, vector<16x1280xbf16>,
    %122 = vector.extract_strided_slice %20 {offsets = [0, 0], sizes = [32, 1], strides = [1, 1]} : vector<32x9xf32> to vector<32x1xf32>
    %cst_55 = arith.constant 0.000000e+00 : f32
    %123 = vector.shape_cast %122 : vector<32x1xf32> to vector<32x1xf32>
    %124 = vector.broadcast %123 : vector<32x1xf32> to vector<32x16xf32>
    %125 = vector.broadcast %cst_55 : f32 to vector<32x16xf32>
    %126 = arith.select %3, %124, %125 : vector<32x16xi1>, vector<32x16xf32>
    %127 = arith.truncf %126 : vector<32x16xf32> to vector<32x16xbf16>
    %c0_56 = arith.constant 0 : index
    %c0_57 = arith.constant 0 : index
    %128 = vector.load %arg15[%c0_56, %c0_57] : memref<16x1280xbf16, #tpu.memory_space<vmem>>, vector<16x128xbf16>
    %cst_58 = arith.constant dense<0.000000e+00> : vector<32x128xf32>
    %129 = tpu.matmul %127, %128, %cst_58 {dimension_numbers = #tpu.dot_dimension_numbers<[1], [0], [0], [1], [0, 0, 1, 1], [], []>} : vector<32x16xbf16>, vector<16x128xbf16>, vector<32x128xf32> -> vector<32x128xf32>
    %130 = vector.extract_strided_slice %20 {offsets = [0, 1], sizes = [32, 1], strides = [1, 1]} : vector<32x9xf32> to vector<32x1xf32>
    %cst_59 = arith.constant 0.000000e+00 : f32
    %131 = vector.shape_cast %130 : vector<32x1xf32> to vector<32x1xf32>
    %132 = vector.broadcast %131 : vector<32x1xf32> to vector<32x16xf32>
    %133 = vector.broadcast %cst_59 : f32 to vector<32x16xf32>
    %134 = arith.select %3, %132, %133 : vector<32x16xi1>, vector<32x16xf32>
    %135 = arith.truncf %134 : vector<32x16xf32> to vector<32x16xbf16>
    %c0_60 = arith.constant 0 : index
    %c128_61 = arith.constant 128 : index
    %136 = vector.load %arg15[%c0_60, %c128_61] : memref<16x1280xbf16, #tpu.memory_space<vmem>>, vector<16x128xbf16>
    %cst_62 = arith.constant dense<0.000000e+00> : vector<32x128xf32>
    %137 = tpu.matmul %135, %136, %cst_62 {dimension_numbers = #tpu.dot_dimension_numbers<[1], [0], [0], [1], [0, 0, 1, 1], [], []>} : vector<32x16xbf16>, vector<16x128xbf16>, vector<32x128xf32> -> vector<32x128xf32>
    %138 = arith.addf %129, %137 : vector<32x128xf32>
    %139 = vector.extract_strided_slice %20 {offsets = [0, 2], sizes = [32, 1], strides = [1, 1]} : vector<32x9xf32> to vector<32x1xf32>
    %cst_63 = arith.constant 0.000000e+00 : f32
    %140 = vector.shape_cast %139 : vector<32x1xf32> to vector<32x1xf32>
    %141 = vector.broadcast %140 : vector<32x1xf32> to vector<32x16xf32>
    %142 = vector.broadcast %cst_63 : f32 to vector<32x16xf32>
    %143 = arith.select %3, %141, %142 : vector<32x16xi1>, vector<32x16xf32>
    %144 = arith.truncf %143 : vector<32x16xf32> to vector<32x16xbf16>
    %c0_64 = arith.constant 0 : index
    %c256_65 = arith.constant 256 : index
    %145 = vector.load %arg15[%c0_64, %c256_65] : memref<16x1280xbf16, #tpu.memory_space<vmem>>, vector<16x128xbf16>
    %cst_66 = arith.constant dense<0.000000e+00> : vector<32x128xf32>
    %146 = tpu.matmul %144, %145, %cst_66 {dimension_numbers = #tpu.dot_dimension_numbers<[1], [0], [0], [1], [0, 0, 1, 1], [], []>} : vector<32x16xbf16>, vector<16x128xbf16>, vector<32x128xf32> -> vector<32x128xf32>
    %147 = arith.addf %138, %146 : vector<32x128xf32>
    %148 = vector.extract_strided_slice %20 {offsets = [0, 3], sizes = [32, 1], strides = [1, 1]} : vector<32x9xf32> to vector<32x1xf32>
    %cst_67 = arith.constant 0.000000e+00 : f32
    %149 = vector.shape_cast %148 : vector<32x1xf32> to vector<32x1xf32>
    %150 = vector.broadcast %149 : vector<32x1xf32> to vector<32x16xf32>
    %151 = vector.broadcast %cst_67 : f32 to vector<32x16xf32>
    %152 = arith.select %3, %150, %151 : vector<32x16xi1>, vector<32x16xf32>
    %153 = arith.truncf %152 : vector<32x16xf32> to vector<32x16xbf16>
    %c0_68 = arith.constant 0 : index
    %c384_69 = arith.constant 384 : index
    %154 = vector.load %arg15[%c0_68, %c384_69] : memref<16x1280xbf16, #tpu.memory_space<vmem>>, vector<16x128xbf16>
    %cst_70 = arith.constant dense<0.000000e+00> : vector<32x128xf32>
    %155 = tpu.matmul %153, %154, %cst_70 {dimension_numbers = #tpu.dot_dimension_numbers<[1], [0], [0], [1], [0, 0, 1, 1], [], []>} : vector<32x16xbf16>, vector<16x128xbf16>, vector<32x128xf32> -> vector<32x128xf32>
    %156 = arith.addf %147, %155 : vector<32x128xf32>
    %157 = vector.extract_strided_slice %20 {offsets = [0, 4], sizes = [32, 1], strides = [1, 1]} : vector<32x9xf32> to vector<32x1xf32>
    %cst_71 = arith.constant 0.000000e+00 : f32
    %158 = vector.shape_cast %157 : vector<32x1xf32> to vector<32x1xf32>
    %159 = vector.broadcast %158 : vector<32x1xf32> to vector<32x16xf32>
    %160 = vector.broadcast %cst_71 : f32 to vector<32x16xf32>
    %161 = arith.select %3, %159, %160 : vector<32x16xi1>, vector<32x16xf32>
    %162 = arith.truncf %161 : vector<32x16xf32> to vector<32x16xbf16>
    %c0_72 = arith.constant 0 : index
    %c512_73 = arith.constant 512 : index
    %163 = vector.load %arg15[%c0_72, %c512_73] : memref<16x1280xbf16, #tpu.memory_space<vmem>>, vector<16x128xbf16>
    %cst_74 = arith.constant dense<0.000000e+00> : vector<32x128xf32>
    %164 = tpu.matmul %162, %163, %cst_74 {dimension_numbers = #tpu.dot_dimension_numbers<[1], [0], [0], [1], [0, 0, 1, 1], [], []>} : vector<32x16xbf16>, vector<16x128xbf16>, vector<32x128xf32> -> vector<32x128xf32>
    %165 = arith.addf %156, %164 : vector<32x128xf32>
    %166 = vector.extract_strided_slice %20 {offsets = [0, 5], sizes = [32, 1], strides = [1, 1]} : vector<32x9xf32> to vector<32x1xf32>
    %cst_75 = arith.constant 0.000000e+00 : f32
    %167 = vector.shape_cast %166 : vector<32x1xf32> to vector<32x1xf32>
    %168 = vector.broadcast %167 : vector<32x1xf32> to vector<32x16xf32>
    %169 = vector.broadcast %cst_75 : f32 to vector<32x16xf32>
    %170 = arith.select %3, %168, %169 : vector<32x16xi1>, vector<32x16xf32>
    %171 = arith.truncf %170 : vector<32x16xf32> to vector<32x16xbf16>
    %c0_76 = arith.constant 0 : index
    %c640_77 = arith.constant 640 : index
    %172 = vector.load %arg15[%c0_76, %c640_77] : memref<16x1280xbf16, #tpu.memory_space<vmem>>, vector<16x128xbf16>
    %cst_78 = arith.constant dense<0.000000e+00> : vector<32x128xf32>
    %173 = tpu.matmul %171, %172, %cst_78 {dimension_numbers = #tpu.dot_dimension_numbers<[1], [0], [0], [1], [0, 0, 1, 1], [], []>} : vector<32x16xbf16>, vector<16x128xbf16>, vector<32x128xf32> -> vector<32x128xf32>
    %174 = arith.addf %165, %173 : vector<32x128xf32>
    %175 = vector.extract_strided_slice %20 {offsets = [0, 6], sizes = [32, 1], strides = [1, 1]} : vector<32x9xf32> to vector<32x1xf32>
    %cst_79 = arith.constant 0.000000e+00 : f32
    %176 = vector.shape_cast %175 : vector<32x1xf32> to vector<32x1xf32>
    %177 = vector.broadcast %176 : vector<32x1xf32> to vector<32x16xf32>
    %178 = vector.broadcast %cst_79 : f32 to vector<32x16xf32>
    %179 = arith.select %3, %177, %178 : vector<32x16xi1>, vector<32x16xf32>
    %180 = arith.truncf %179 : vector<32x16xf32> to vector<32x16xbf16>
    %c0_80 = arith.constant 0 : index
    %c768_81 = arith.constant 768 : index
    %181 = vector.load %arg15[%c0_80, %c768_81] : memref<16x1280xbf16, #tpu.memory_space<vmem>>, vector<16x128xbf16>
    %cst_82 = arith.constant dense<0.000000e+00> : vector<32x128xf32>
    %182 = tpu.matmul %180, %181, %cst_82 {dimension_numbers = #tpu.dot_dimension_numbers<[1], [0], [0], [1], [0, 0, 1, 1], [], []>} : vector<32x16xbf16>, vector<16x128xbf16>, vector<32x128xf32> -> vector<32x128xf32>
    %183 = arith.addf %174, %182 : vector<32x128xf32>
    %184 = vector.extract_strided_slice %20 {offsets = [0, 7], sizes = [32, 1], strides = [1, 1]} : vector<32x9xf32> to vector<32x1xf32>
    %cst_83 = arith.constant 0.000000e+00 : f32
    %185 = vector.shape_cast %184 : vector<32x1xf32> to vector<32x1xf32>
    %186 = vector.broadcast %185 : vector<32x1xf32> to vector<32x16xf32>
    %187 = vector.broadcast %cst_83 : f32 to vector<32x16xf32>
    %188 = arith.select %3, %186, %187 : vector<32x16xi1>, vector<32x16xf32>
    %189 = arith.truncf %188 : vector<32x16xf32> to vector<32x16xbf16>
    %c0_84 = arith.constant 0 : index
    %c896_85 = arith.constant 896 : index
    %190 = vector.load %arg15[%c0_84, %c896_85] : memref<16x1280xbf16, #tpu.memory_space<vmem>>, vector<16x128xbf16>
    %cst_86 = arith.constant dense<0.000000e+00> : vector<32x128xf32>
    %191 = tpu.matmul %189, %190, %cst_86 {dimension_numbers = #tpu.dot_dimension_numbers<[1], [0], [0], [1], [0, 0, 1, 1], [], []>} : vector<32x16xbf16>, vector<16x128xbf16>, vector<32x128xf32> -> vector<32x128xf32>
    %192 = arith.addf %183, %191 : vector<32x128xf32>
    %193 = vector.extract_strided_slice %20 {offsets = [0, 8], sizes = [32, 1], strides = [1, 1]} : vector<32x9xf32> to vector<32x1xf32>
    %cst_87 = arith.constant 0.000000e+00 : f32
    %194 = vector.shape_cast %193 : vector<32x1xf32> to vector<32x1xf32>
    %195 = vector.broadcast %194 : vector<32x1xf32> to vector<32x16xf32>
    %196 = vector.broadcast %cst_87 : f32 to vector<32x16xf32>
    %197 = arith.select %3, %195, %196 : vector<32x16xi1>, vector<32x16xf32>
    %198 = arith.truncf %197 : vector<32x16xf32> to vector<32x16xbf16>
    %c0_88 = arith.constant 0 : index
    %c1024_89 = arith.constant 1024 : index
    %199 = vector.load %arg15[%c0_88, %c1024_89] : memref<16x1280xbf16, #tpu.memory_space<vmem>>, vector<16x128xbf16>
    %cst_90 = arith.constant dense<0.000000e+00> : vector<32x128xf32>
    %200 = tpu.matmul %198, %199, %cst_90 {dimension_numbers = #tpu.dot_dimension_numbers<[1], [0], [0], [1], [0, 0, 1, 1], [], []>} : vector<32x16xbf16>, vector<16x128xbf16>, vector<32x128xf32> -> vector<32x128xf32>
    %201 = arith.addf %192, %200 : vector<32x128xf32>
    %202 = arith.truncf %201 : vector<32x128xf32> to vector<32x128xbf16>
    %cst_91 = arith.constant dense<0.000000e+00> : vector<16x128xf32>
    %203 = tpu.matmul %11, %202, %cst_91 {dimension_numbers = #tpu.dot_dimension_numbers<[1], [0], [0], [1], [0, 0, 1, 1], [], []>} : vector<16x32xbf16>, vector<32x128xbf16>, vector<16x128xf32> -> vector<16x128xf32>
    %c0_92 = arith.constant 0 : index
    %c1152_93 = arith.constant 1152 : index
    %204 = vector.load %arg15[%c0_92, %c1152_93] : memref<16x1280xbf16, #tpu.memory_space<vmem>>, vector<16x128xbf16>
    %205 = arith.extf %204 : vector<16x128xbf16> to vector<16x128xf32>
    %206 = arith.addf %203, %205 : vector<16x128xf32>
    %c0_94 = arith.constant 0 : index
    %c0_95 = arith.constant 0 : index
    %207 = vector.load %arg9[%c0_94, %c0_95] : memref<1x128xf32, #tpu.memory_space<vmem>>, vector<1x128xf32>
    %208 = vector.broadcast %207 : vector<1x128xf32> to vector<16x128xf32>
    %209 = arith.addf %206, %208 : vector<16x128xf32>
    %210 = arith.truncf %209 : vector<16x128xf32> to vector<16x128xbf16>
    %cst_96 = arith.constant dense<0.000000e+00> : vector<2x128xf32>
    %211 = tpu.matmul %19, %210, %cst_96 {dimension_numbers = #tpu.dot_dimension_numbers<[1], [0], [0], [1], [0, 0, 1, 1], [], []>} : vector<2x16xbf16>, vector<16x128xbf16>, vector<2x128xf32> -> vector<2x128xf32>
    %c0_97 = arith.constant 0 : index
    %c0_98 = arith.constant 0 : index
    %212 = vector.load %arg3[%c0_97, %c0_98] : memref<2x1xf32, #tpu.memory_space<vmem>>, vector<2x1xf32>
    %213 = vector.broadcast %212 : vector<2x1xf32> to vector<2x128xf32>
    %214 = arith.mulf %211, %213 : vector<2x128xf32>
    %215 = arith.truncf %214 : vector<2x128xf32> to vector<2x128xbf16>
    %c0_99 = arith.constant 0 : index
    %c0_100 = arith.constant 0 : index
    %216 = vector.load %arg10[%c0_99, %c0_100] : memref<128x64xbf16, #tpu.memory_space<vmem>>, vector<128x64xbf16>
    %cst_101 = arith.constant dense<0.000000e+00> : vector<2x64xf32>
    %217 = tpu.matmul %215, %216, %cst_101 {dimension_numbers = #tpu.dot_dimension_numbers<[1], [0], [0], [1], [0, 0, 1, 1], [], []>} : vector<2x128xbf16>, vector<128x64xbf16>, vector<2x64xf32> -> vector<2x64xf32>
    %c0_102 = arith.constant 0 : index
    %c0_103 = arith.constant 0 : index
    %218 = vector.load %arg11[%c0_102, %c0_103] : memref<1x64xf32, #tpu.memory_space<vmem>>, vector<1x64xf32>
    %219 = vector.broadcast %218 : vector<1x64xf32> to vector<2x64xf32>
    %220 = arith.addf %217, %219 : vector<2x64xf32>
    %cst_104 = arith.constant 0.000000e+00 : f32
    %221 = vector.broadcast %cst_104 : f32 to vector<2x64xf32>
    %222 = arith.maximumf %220, %221 : vector<2x64xf32>
    %223 = arith.truncf %222 : vector<2x64xf32> to vector<2x64xbf16>
    %c0_105 = arith.constant 0 : index
    %c0_106 = arith.constant 0 : index
    %224 = vector.load %arg12[%c0_105, %c0_106] : memref<64x1xbf16, #tpu.memory_space<vmem>>, vector<64x1xbf16>
    %cst_107 = arith.constant dense<0.000000e+00> : vector<2x1xf32>
    %225 = tpu.matmul %223, %224, %cst_107 {dimension_numbers = #tpu.dot_dimension_numbers<[1], [0], [0], [1], [0, 0, 1, 1], [], []>} : vector<2x64xbf16>, vector<64x1xbf16>, vector<2x1xf32> -> vector<2x1xf32>
    %c0_108 = arith.constant 0 : index
    %c0_109 = arith.constant 0 : index
    %226 = vector.load %arg13[%c0_108, %c0_109] : memref<1x1xf32, #tpu.memory_space<vmem>>, vector<1x1xf32>
    %227 = vector.broadcast %226 : vector<1x1xf32> to vector<2x1xf32>
    %228 = arith.addf %225, %227 : vector<2x1xf32>
    %cst_110 = arith.constant 0.000000e+00 : f32
    %229 = vector.broadcast %cst_110 : f32 to vector<2x1xf32>
    %230 = arith.subf %229, %228 : vector<2x1xf32>
    %231 = math.exp %230 : vector<2x1xf32>
    %cst_111 = arith.constant 1.000000e+00 : f32
    %232 = vector.broadcast %cst_111 : f32 to vector<2x1xf32>
    %233 = arith.addf %232, %231 : vector<2x1xf32>
    %cst_112 = arith.constant 1.000000e+00 : f32
    %234 = vector.broadcast %cst_112 : f32 to vector<2x1xf32>
    %235 = arith.divf %234, %233 : vector<2x1xf32>
    %c0_113 = arith.constant 0 : index
    %c0_114 = arith.constant 0 : index
    %236 = vector.load %arg14[%c0_113, %c0_114] : memref<2x1xf32, #tpu.memory_space<vmem>>, vector<2x1xf32>
    tpu.vector_store %arg14[%c0_113, %c0_114], %235 {strides = array<i32>} : memref<2x1xf32, #tpu.memory_space<vmem>>, vector<2x1xf32>,
    return
  }
}

</mosaic_0001>

<bundles_post_ra>
// kernel: tpu_custom_call.1
= control target key start
LH: loop header
LB: loop body
LE: loop exit
PB: predicated region body
PF: predicated region fallthrough
CT: control target
= control target key end

     0   :  { %s3986_s0 = inlined_call_operand.vmem [shape: s32[32,1], index: 0, kind: input, shape index: {}]   ;;  %s3987_s1 = inlined_call_operand.vmem [shape: s32[1,32], index: 1, kind: input, shape index: {}]   ;;  %s3988_s2 = inlined_call_operand.vmem [shape: s32[1,16], index: 2, kind: input, shape index: {}]   ;;  %s3989_s3 = inlined_call_operand.vmem [shape: f32[2,1], index: 3, kind: input, shape index: {}]   ;;  %s3990_s4 = inlined_call_operand.vmem [shape: f32[16,16], index: 4, kind: input, shape index: {}]   ;;  %s3991_s5 = inlined_call_operand.vmem [shape: f32[32,9], index: 5, kind: input, shape index: {}]   ;;  %s3992_s6 = inlined_call_operand.vmem [shape: bf16[16,1280], index: 6, kind: input, shape index: {}]   ;;  %s3993_s7 = inlined_call_operand.vmem [shape: f32[1,128], index: 7, kind: input, shape index: {}]   ;;  %s3994_s8 = inlined_call_operand.hbm [shape: bf16[128,1280], index: 8, kind: input, shape index: {}]   ;;  %s3995_s9 = inlined_call_operand.vmem [shape: f32[1,128], index: 9, kind: input, shape index: {}]   ;;  %s3996_s10 = inlined_call_operand.vmem [shape: bf16[128,64], index: 10, kind: input, shape index: {}]   ;;  %s3997_s11 = inlined_call_operand.vmem [shape: f32[1,64], index: 11, kind: input, shape index: {}]   ;;  %s3998_s12 = inlined_call_operand.vmem [shape: bf16[64,1], index: 12, kind: input, shape index: {}]   ;;  %s3999_s13 = inlined_call_operand.<no memory space> [shape: f32[1,1], index: 13, kind: input, shape index: {}]   ;;  %s4000_s14 = inlined_call_operand.vmem [shape: f32[2,1], index: 14, kind: output, shape index: {}]  }
   0x1   :  { %v19_v0 = vstv %s3999_s13 }
   0x2   :  { %20 = vst [vmem:[#allocation3] sm:$0x1] %v19_v0 }
   0x3   :  { %21 = vsyncpa [#allocation5], 0  ;;  %s3470_s15 = smov [#allocation4]   ;;  %s3446_s19 = scalar_lea.hbm %s3994_s8, 10240 }
   0x4   :  { %s43_s16 = sshll.u32 %s3470_s15, 4  ;;  %p3447_p0 = scmp.ne.s32.totalorder %s3994_s8, %s3446_s19  ;;  %s44_s16 = int_to_ptr.vmem [resolvable:$true] %s43_s16 }
   0x5   :  { %p3450_p1 = scmp.lt.u32.totalorder %s3446_s19, %s3994_s8 }
   0x7   :  { %p3452_p2 = pnand %p3450_p1, %p3447_p0 }
   0x9   :  { %3455 = shalt.err (!%p3452_p2)
}
   0xa   :  { %s3456_s13 = scalar_lea.vmem %s44_s16, 10240  ;;  %p3461_p4 = scmp.lt.s32.totalorder %s44_s16, %s44_s16 }
   0xb   :  { %p3457_p3 = scmp.ne.s32.totalorder %s44_s16, %s3456_s13  ;;  %p3462_p5 = scmp.lt.s32.totalorder %s3456_s13, %s3456_s13 }
   0xd   :  { %p3463_p6 = por %p3462_p5, %p3461_p4 }
   0xf   :  { %p3464_p7 = pnand %p3463_p6, %p3457_p3 }
  0x11   :  { %3467 = shalt.err (!%p3464_p7)
}
  0x12   :  { %s3471_s24 = smov 640   ;;  %s3472_s25 = smov 40  }
  0x13   :  { %49 = dma.hbm_to_vmem [thread:$0]  %s3994_s8, 10240, %s44_s16, [#allocation5], %s3471_s24, %s3471_s24, %s3472_s25  }
  0x14   :  { %3468 = dma.done.wait [#allocation5], 10240  }
  0x15   :  { %3469 = vsyncadd [#allocation5], 4294957056  ;;  %v3473_v1 = vmov 0   ;;  %v3295_v2 = vld [vmem:[%s3992_s6 + $0x4] ss:$40 sps:$4 sm:$0xff]   ;;  %vm174_vm0 = vcmask 130048   ;;  %v64_v36 = vlaneseq }
  0x16   :  { %210 = vmatprep.mubr.bf16.mxu1 %v3473_v1  ;;  %3188 = vset.pattern.permute.xlu1 %v3473_v1  ;;  %v3297_v3 = vld [vmem:[%s3992_s6] ss:$40 sps:$4 sm:$0xff]   ;;  %v3300_v8 = vld [vmem:[%s3992_s6 + $0xc] ss:$40 sps:$4 sm:$0xff]   ;;  %v69_v10 = vld [vmem:[%s3986_s0 + $0x18] sm:$0xff]  ;;  %v3474_v24 = vmov 1  }
  0x17   :  { %3187 = vset.pattern.permute.xlu0 %v3473_v1  ;;  %296 = vmatprep.mubr.bf16.mxu0 %v3473_v1  ;;  %v111_v4 = vld [vmem:[%s3990_s4] sm:$0xff]  ;;  %v112_v5 = vld [vmem:[%s3990_s4 + $0x8] sm:$0xff]  ;;  %v68_v9 = vld [vmem:[%s3986_s0 + $0x10] sm:$0xff]  ;;  %v3475_v26 = vmov 2   ;;  %v3476_v27 = vmov 3   ;;  %v3477_v28 = vmov 4  }
  0x18   :  { %178 = vmatprep.subr.bf16.mxu1 %v3295_v2  ;;  %v113_v6 = vpack.c.bf16 %v112_v5, %v111_v4  ;;  %v3298_v7 = vld [vmem:[%s3992_s6 + $0x8] ss:$40 sps:$4 sm:$0xff]   ;;  %77 = vperm.xlu1 %3188, %v68_v9   ;;  %v110_v12 = vld [vmem:[%s3991_s5 + $0x18] sm:$0xff]  ;;  %v66_v15 = vld [vmem:[%s3986_s0] sm:$0xff]  ;;  %v3478_v29 = vmov 6   ;;  %v3479_v30 = vmov 5  }
  0x19   :  { %179 = vmatpush1.bf16.msra.mxu1 %v3297_v3  ;;  %v109_v11 = vld [vmem:[%s3991_s5 + $0x10] sm:$0xff]  ;;  %v67_v16 = vld [vmem:[%s3986_s0 + $0x8] sm:$0xff]  ;;  %v3306_v17 = vld [vmem:[%s3992_s6 + $0x1c] ss:$40 sps:$4 sm:$0xff]   ;;  %71 = vperm.xlu0 %3187, %v66_v15   ;;  %v3480_v31 = vmov 7   ;;  %v3481_v32 = vmov 8  }
  0x1a   :  { %221 = vmatprep.subr.bf16.mxu1 %v3300_v8  ;;  %v3301_v13 = vld [vmem:[%s3992_s6 + $0x14] ss:$40 sps:$4 sm:$0xff]   ;;  %v3303_v14 = vld [vmem:[%s3992_s6 + $0x10] ss:$40 sps:$4 sm:$0xff]   ;;  %v3196_v18 = vpack.i.bf16 %v110_v12, %v109_v11  ;;  %v107_v19 = vld [vmem:[%s3991_s5] sm:$0xff]  ;;  %v65_v39 = vand.u32 127, %v64_v36 }
  0x1b   :  { %264 = vmatprep.subr.bf16.mxu0 %v3301_v13  ;;  %v108_v20 = vld [vmem:[%s3991_s5 + $0x8] sm:$0xff]  ;;  %v3304_v21 = vld [vmem:[%s3992_s6 + $0x18] ss:$40 sps:$4 sm:$0xff]   ;;  %vm3483_vm5 = vmmov 0   ;;  %vm1152_vm8 = vcmask 261120   ;;  %vm2661_vm10 = vcmask 523264  }
  0x1c   :  { %2730 = vmatmul.mubr.msk.bf16.vlgmr.msra.gmra.mrb[0].mxu1 %vm174_vm0, %v113_v6  ;;  %80 = vperm.xlu1 %3188, %v69_v10   ;;  %v3307_v22 = vld [vmem:[%s3992_s6 + $0x20] ss:$40 sps:$4 sm:$0xff]   ;;  %v3309_v23 = vld [vmem:[%s3992_s6 + $0x24] ss:$40 sps:$4 sm:$0xff]   ;;  %v3202_v25 = vpack.i.bf16 %v108_v20, %v107_v19  ;;  %v3482_v20 = vmov 0.0   ;;  %vm2711_vm11 = vcmask 1024  }
  0x1d   :  { %222 = vmatpush1.bf16.msra.mxu1 %v3298_v7  ;;  %253 = vmatprep.mubr.bf16.mxu1 %v3473_v1 }
  0x1e   :  { %265 = vmatpush1.bf16.msra.mxu0 %v3303_v14  ;;  %307 = vmatprep.subr.bf16.mxu1 %v3306_v17 }
  0x1f   :  { %350 = vmatprep.subr.bf16.mxu0 %v3309_v23  ;;  %74 = vperm.xlu0 %3187, %v67_v16  }
  0x20   :  { %3195 = vset.pattern.permute.xlu1 %v3474_v24 }
  0x21   :  { %2732 = vmatmul.mubr.msk.bf16.vlgmr.msra.gmra.mrb[0].mxu0 %vm174_vm0, %v113_v6  ;;  %3197 = vperm.xlu1 %3195, %v3196_v18  }
  0x22   :  { %351 = vmatpush1.bf16.msra.mxu0 %v3307_v22  ;;  %382 = vmatprep.mubr.bf16.mxu0 %v3473_v1 }
  0x23   :  { %3189 = vset.pattern.permute.xlu0 %v3474_v24  ;;  %3001 = vmatprep.subr.bf16.mxu0 %v3482_v20 }
  0x24   :  { %2731 = vmatmul.mubr.msk.bf16.vlgmr.msra.gmra.mrb[4].mxu1 %vm174_vm0, %v113_v6  ;;  %3191 = vperm.xlu0 %3189, %v3202_v25  }
  0x25   :  { %308 = vmatpush1.bf16.msra.mxu1 %v3304_v21  ;;  %339 = vmatprep.mubr.bf16.mxu1 %v3473_v1  ;;  %v3313_v21 = vld [vmem:[#allocation4 + $0x10] ss:$40 sps:$4 sm:$0xff]  }
  0x26   :  { %3201 = vset.pattern.permute.xlu1 %v3473_v1 }
  0x27   :  { %3203 = vperm.xlu1 %3201, %v3202_v25  }
  0x28   :  { %3207 = vset.pattern.permute.xlu0 %v3473_v1 }
  0x29   :  { %2734 = vmatmul.mubr.msk.bf16.vlgmr.msra.gmra.mrb[4].mxu0 %vm174_vm0, %v113_v6  ;;  %3209 = vperm.xlu0 %3207, %v3196_v18  }
  0x2a   :  { %3005 = vmatprep.mubr.msk.bf16.mxu0 %vm3483_vm5, %v3482_v20 }
  0x2b   :  { %3213 = vset.pattern.permute.xlu1 %v3475_v26 }
  0x2c   :  { %3215 = vperm.xlu1 %3213, %v3202_v25   ;;  %2733 = vmatmul.mubr.msk.bf16.vlgmr.msra.gmra.mrb[8].mxu1 %vm174_vm0, %v113_v6 }
  0x2d   :  { %3224 = vset.pattern.permute.xlu0 %v3476_v27 }
  0x2e   :  { %3226 = vperm.xlu0 %3224, %v3202_v25  }
  0x30   :  { %3220 = vperm.xlu1 %3213, %v3196_v18  }
  0x32   :  { %3242 = vset.pattern.permute.xlu0 %v3477_v28 }
  0x33   :  { %3244 = vperm.xlu0 %3242, %v3196_v18  }
  0x34   :  { %3230 = vset.pattern.permute.xlu1 %v3476_v27 }
  0x35   :  { %3232 = vperm.xlu1 %3230, %v3196_v18  }
  0x37   :  { %3259 = vset.pattern.permute.xlu0 %v3478_v29 }
  0x38   :  { %3261 = vperm.xlu0 %3259, %v3202_v25  }
  0x39   :  { %3236 = vset.pattern.permute.xlu1 %v3477_v28 }
  0x3a   :  { %3238 = vperm.xlu1 %3236, %v3202_v25  }
  0x3c   :  { %3277 = vset.pattern.permute.xlu0 %v3480_v31 }
  0x3d   :  { %3279 = vperm.xlu0 %3277, %v3196_v18  }
  0x3e   :  { %3248 = vset.pattern.permute.xlu1 %v3479_v30 }
  0x3f   :  { %3250 = vperm.xlu1 %3248, %v3202_v25  }
  0x41   :  { %3294 = vset.pattern.permute.xlu0 %v3473_v1 }
  0x43   :  { %3255 = vperm.xlu1 %3248, %v3196_v18  }
  0x47   :  { %3265 = vset.pattern.permute.xlu1 %v3478_v29 }
  0x48   :  { %3267 = vperm.xlu1 %3265, %v3196_v18  }
  0x4c   :  { %3271 = vset.pattern.permute.xlu1 %v3480_v31 }
  0x4d   :  { %3273 = vperm.xlu1 %3271, %v3202_v25  }
  0x51   :  { %3283 = vset.pattern.permute.xlu1 %v3481_v32 }
  0x52   :  { %3285 = vperm.xlu1 %3283, %v3202_v25  }
  0x56   :  { %3290 = vperm.xlu1 %3283, %v3196_v18  }
  0x97   :  { %v78_v33 = vpop.permute.xlu1 %77 }
  0x98   :  { %v72_v35 = vpop.permute.xlu0 %71  ;;  %vm3706_vm3 = vcmp.eq.s32.totalorder %v65_v39, %v78_v33 }
  0x99   :  { %vm3652_vm1 = vcmp.eq.s32.totalorder %v65_v39, %v72_v35 }
  0x9b   :  { %v81_v34 = vpop.permute.xlu1 %80 }
  0x9c   :  { %vm3710_vm4 = vcmp.eq.s32.totalorder %v65_v39, %v81_v34 }
  0x9e   :  { %v75_v38 = vpop.permute.xlu0 %74 }
  0x9f   :  { %vm3656_vm2 = vcmp.eq.s32.totalorder %v65_v39, %v75_v38 }
  0xa0   :  { %v3649_v37 = vpop.permute.xlu1 %3197 }
  0xa1   :  { %v3200_v41 = vunpack.i.h.bf16 %v3649_v37 }
  0xa3   :  { %v3192_v43 = vpop.permute.xlu0 %3191 }
  0xa4   :  { %v3194_v46 = vunpack.i.h.bf16 %v3192_v43  ;;  %v3193_v47 = vunpack.i.l.bf16 %v3192_v43 }
  0xa6   :  { %v3204_v40 = vpop.permute.xlu1 %3203  ;;  %v457_v48 = vsel %vm3656_vm2, %v3194_v46, 0.0  ;;  %v456_v49 = vsel %vm3652_vm1, %v3193_v47, 0.0 }
  0xa7   :  { %v3206_v44 = vunpack.i.h.bf16 %v3204_v40  ;;  %v3205_v45 = vunpack.i.l.bf16 %v3204_v40  ;;  %v3668_v52 = vpack.c.bf16 %v457_v48, %v456_v49 }
  0xa8   :  { %v3672_v55 = vpop.permute.xlu0 %3209 }
  0xa9   :  { %v433_v50 = vsel %vm3652_vm1, %v3205_v45, 0.0  ;;  %v434_v51 = vsel %vm3656_vm2, %v3206_v44, 0.0  ;;  %2949 = vmatprep.mubr.msk.bf16.mxu1 %vm174_vm0, %v3668_v52 }
  0xaa   :  { %v3670_v53 = vpack.c.bf16 %v434_v51, %v433_v50 }
  0xab   :  { %v3216_v54 = vpop.permute.xlu1 %3215 }
  0xac   :  { %v3218_v56 = vunpack.i.h.bf16 %v3216_v54  ;;  %v3217_v57 = vunpack.i.l.bf16 %v3216_v54 }
  0xad   :  { %v3227_v62 = vpop.permute.xlu0 %3226 }
  0xae   :  { %v589_v58 = vsel %vm3652_vm1, %v3217_v57, 0.0  ;;  %v590_v59 = vsel %vm3656_vm2, %v3218_v56, 0.0  ;;  %v3229_v63 = vunpack.i.h.bf16 %v3227_v62  ;;  %v3228_v0 = vunpack.i.l.bf16 %v3227_v62 }
  0xaf   :  { %v3680_v60 = vpop.permute.xlu1 %3220  ;;  %v3682_v61 = vpack.c.bf16 %v590_v59, %v589_v58 }
  0xb0   :  { %v672_v2 = vsel %vm3656_vm2, %v3229_v63, 0.0  ;;  %v671_v3 = vsel %vm3652_vm1, %v3228_v0, 0.0 }
  0xb1   :  { %v3690_v5 = vpack.c.bf16 %v672_v2, %v671_v3 }
  0xb2   :  { %v3692_v6 = vpop.permute.xlu0 %3244 }
  0xb4   :  { %v3688_v4 = vpop.permute.xlu1 %3232 }
  0xb7   :  { %v3262_v10 = vpop.permute.xlu0 %3261 }
  0xb8   :  { %v3264_v11 = vunpack.i.h.bf16 %v3262_v10  ;;  %v3263_v12 = vunpack.i.l.bf16 %v3262_v10 }
  0xb9   :  { %v3239_v7 = vpop.permute.xlu1 %3238 }
  0xba   :  { %v3241_v8 = vunpack.i.h.bf16 %v3239_v7  ;;  %v3240_v9 = vunpack.i.l.bf16 %v3239_v7  ;;  %v918_v15 = vsel %vm3656_vm2, %v3264_v11, 0.0  ;;  %v917_v16 = vsel %vm3652_vm1, %v3263_v12, 0.0 }
  0xbb   :  { %v3704_v19 = vpack.c.bf16 %v918_v15, %v917_v16 }
  0xbc   :  { %v753_v13 = vsel %vm3652_vm1, %v3240_v9, 0.0  ;;  %v754_v14 = vsel %vm3656_vm2, %v3241_v8, 0.0  ;;  %v3280_v24 = vpop.permute.xlu0 %3279  ;;  %v3199_v8 = vunpack.i.l.bf16 %v3649_v37 }
  0xbd   :  { %v3702_v17 = vpack.c.bf16 %v754_v14, %v753_v13  ;;  %v3282_v25 = vunpack.i.h.bf16 %v3280_v24  ;;  %v3281_v26 = vunpack.i.l.bf16 %v3280_v24  ;;  %v459_v13 = vsel %vm3710_vm4, %v3200_v41, 0.0 }
  0xbe   :  { %v3251_v18 = vpop.permute.xlu1 %3250  ;;  %v458_v14 = vsel %vm3706_vm3, %v3199_v8, 0.0  ;;  %v3235_v41 = vunpack.i.h.bf16 %v3688_v4 }
  0xbf   :  { %v3253_v22 = vunpack.i.h.bf16 %v3251_v18  ;;  %v3252_v23 = vunpack.i.l.bf16 %v3251_v18  ;;  %v1002_v31 = vsel %vm3710_vm4, %v3282_v25, 0.0  ;;  %v1001_v32 = vsel %vm3706_vm3, %v3281_v26, 0.0 }
  0xc0   :  { %v3726_v33 = vpack.c.bf16 %v1002_v31, %v1001_v32  ;;  %v3758_v18 = vpack.c.bf16 %v459_v13, %v458_v14  ;;  %v674_v8 = vsel %vm3710_vm4, %v3235_v41, 0.0  ;;  %v3328_v41 = vld [vmem:[#allocation4 + $0xf0] ss:$40 sps:$4 sm:$0xff]  }
  0xc1   :  { %v835_v27 = vsel %vm3652_vm1, %v3252_v23, 0.0  ;;  %v836_v28 = vsel %vm3656_vm2, %v3253_v22, 0.0 }
  0xc2   :  { %v3718_v29 = vpack.c.bf16 %v836_v28, %v835_v27  ;;  %v3720_v30 = vpop.permute.xlu1 %3255 }
  0xc3   :  { %v3258_v14 = vunpack.i.h.bf16 %v3720_v30 }
  0xc7   :  { %v3268_v34 = vpop.permute.xlu1 %3267 }
  0xc8   :  { %v3270_v35 = vunpack.i.h.bf16 %v3268_v34  ;;  %v3269_v38 = vunpack.i.l.bf16 %v3268_v34  ;;  %v3212_v34 = vunpack.i.h.bf16 %v3672_v55 }
  0xca   :  { %v920_v39 = vsel %vm3710_vm4, %v3270_v35, 0.0  ;;  %v919_v40 = vsel %vm3706_vm3, %v3269_v38, 0.0  ;;  %v3211_v35 = vunpack.i.l.bf16 %v3672_v55 }
  0xcb   :  { %v3732_v43 = vpack.c.bf16 %v920_v39, %v919_v40 }
  0xcc   :  { %v3274_v44 = vpop.permute.xlu1 %3273 }
  0xcd   :  { %v3276_v45 = vunpack.i.h.bf16 %v3274_v44  ;;  %v3275_v46 = vunpack.i.l.bf16 %v3274_v44  ;;  %v436_v44 = vsel %vm3710_vm4, %v3212_v34, 0.0  ;;  %v3343_v34 = vld [vmem:[#allocation4 + $0x1a0] ss:$40 sps:$4 sm:$0xff]  }
  0xcf   :  { %v999_v47 = vsel %vm3652_vm1, %v3275_v46, 0.0  ;;  %v1000_v48 = vsel %vm3656_vm2, %v3276_v45, 0.0  ;;  %v435_v45 = vsel %vm3706_vm3, %v3211_v35, 0.0  ;;  %v3841_v35 = vshrl.u32 %v64_v36, 7 }
  0xd0   :  { %v3738_v49 = vpack.c.bf16 %v1000_v48, %v999_v47 }
  0xd1   :  { %v3286_v50 = vpop.permute.xlu1 %3285 }
  0xd2   :  { %v3288_v51 = vunpack.i.h.bf16 %v3286_v50  ;;  %v3287_v54 = vunpack.i.l.bf16 %v3286_v50 }
  0xd4   :  { %v1081_v56 = vsel %vm3652_vm1, %v3287_v54, 0.0  ;;  %v1082_v57 = vsel %vm3656_vm2, %v3288_v51, 0.0  ;;  %v3772_v54 = vpack.c.bf16 %v436_v44, %v435_v45 }
  0xd5   :  { %v3744_v58 = vpack.c.bf16 %v1082_v57, %v1081_v56  ;;  %v3291_v59 = vpop.permute.xlu1 %3290 }
  0xd6   :  { %v3293_v62 = vunpack.i.h.bf16 %v3291_v59  ;;  %v3292_v63 = vunpack.i.l.bf16 %v3291_v59 }
  0xd8   :  { %v1084_v0 = vsel %vm3710_vm4, %v3293_v62, 0.0  ;;  %v1083_v2 = vsel %vm3706_vm3, %v3292_v63, 0.0  ;;  %v3223_v62 = vunpack.i.h.bf16 %v3680_v60  ;;  %v3222_v63 = vunpack.i.l.bf16 %v3680_v60 }
  0xd9   :  { %v3750_v3 = vpack.c.bf16 %v1084_v0, %v1083_v2  ;;  %v3234_v60 = vunpack.i.l.bf16 %v3688_v4  ;;  %v3246_v4 = vunpack.i.l.bf16 %v3692_v6 }
  0xda   :  { %v592_v0 = vsel %vm3710_vm4, %v3223_v62, 0.0  ;;  %v591_v2 = vsel %vm3706_vm3, %v3222_v63, 0.0  ;;  %v3316_v62 = vld [vmem:[#allocation4 + $0x50] ss:$40 sps:$4 sm:$0xff]   ;;  %v3324_v63 = vld [vmem:[#allocation4 + $0xa4] ss:$40 sps:$4 sm:$0xff]  }
  0xef   :  { %v212_v7 = vpop.f32.mrb[0].mxu1 }
  0xf0   :  { %v214_v42 = vpop.f32.mrb[1].mxu1 }
  0xf1   :  { %v216_v9 = vpop.f32.mrb[2].mxu1 }
  0xf2   :  { %v393_v10 = vpack.c.bf16 %v216_v9, %v212_v7  ;;  %v218_v11 = vpop.f32.mrb[3].mxu1  ;;  %v3784_v7 = vpack.c.bf16 %v592_v0, %v591_v2  ;;  %v3322_v0 = vld [vmem:[#allocation4 + $0xa0] ss:$40 sps:$4 sm:$0xff]   ;;  %v3330_v2 = vld [vmem:[#allocation4 + $0xf4] ss:$40 sps:$4 sm:$0xff]  }
  0xf3   :  { %v394_v12 = vpack.c.bf16 %v218_v11, %v214_v42  ;;  %v673_v42 = vsel %vm3706_vm3, %v3234_v60, 0.0  ;;  %v3336_v60 = vld [vmem:[#allocation4 + $0x144] ss:$40 sps:$4 sm:$0xff]  }
  0xf4   :  { %v298_v15 = vpop.f32.mrb[0].mxu0  ;;  %v3796_v9 = vpack.c.bf16 %v674_v8, %v673_v42  ;;  %v3334_v8 = vld [vmem:[#allocation4 + $0x140] ss:$40 sps:$4 sm:$0xff]   ;;  %v3342_v42 = vld [vmem:[#allocation4 + $0x194] ss:$40 sps:$4 sm:$0xff]  }
  0xf5   :  { %2947 = vmatprep.subr.bf16.mxu1 %v394_v12  ;;  %v300_v16 = vpop.f32.mrb[1].mxu0 }
  0xf6   :  { %2948 = vmatpush3.bf16.msra.mxu1 %v394_v12  ;;  %v302_v37 = vpop.f32.mrb[2].mxu0  ;;  %v755_v12 = vsel %vm3706_vm3, %v3246_v4, 0.0  ;;  %v3348_v4 = vld [vmem:[#allocation4 + $0x1e4] ss:$40 sps:$4 sm:$0xff]  }
  0xf7   :  { %2953 = vmatprep.subr.bf16.mxu1 %v393_v10  ;;  %v255_v22 = vpop.f32.mrb[4].mxu1  ;;  %v397_v24 = vpack.c.bf16 %v302_v37, %v298_v15  ;;  %v304_v25 = vpop.f32.mrb[3].mxu0  ;;  %v838_v15 = vsel %vm3710_vm4, %v3258_v14, 0.0  ;;  %v3321_v37 = vld [vmem:[#allocation4 + $0x64] ss:$40 sps:$4 sm:$0xff]  }
  0xf8   :  { %v257_v23 = vpop.f32.mrb[5].mxu1  ;;  %v398_v27 = vpack.c.bf16 %v304_v25, %v300_v16  ;;  %v3325_v25 = vld [vmem:[#allocation4 + $0xb0] ss:$40 sps:$4 sm:$0xff]  }
  0xf9   :  { %2950 = vmatmul.mubr.msk.bf16.vlgmr.msra.gmra.mrb[12].mxu1 %vm174_vm0, %v3758_v18  ;;  %v259_v26 = vpop.f32.mrb[6].mxu1  ;;  %v3349_v14 = vld [vmem:[#allocation4 + $0x1f0] ss:$40 sps:$4 sm:$0xff]  }
  0xfa   :  { %2954 = vmatpush3.bf16.msra.mxu1 %v393_v10  ;;  %2955 = vmatprep.mubr.msk.bf16.mxu1 %vm174_vm0, %v3670_v53  ;;  %v395_v28 = vpack.c.bf16 %v259_v26, %v255_v22  ;;  %v261_v31 = vpop.f32.mrb[7].mxu1  ;;  %v3247_v10 = vunpack.i.h.bf16 %v3692_v6  ;;  %v3257_v6 = vunpack.i.l.bf16 %v3720_v30  ;;  %v3315_v30 = vld [vmem:[#allocation4 + $0x14] ss:$40 sps:$4 sm:$0xff]   ;;  %v3333_v26 = vld [vmem:[#allocation4 + $0x104] ss:$40 sps:$4 sm:$0xff]  }
  0xfb   :  { %v396_v32 = vpack.c.bf16 %v261_v31, %v257_v23  ;;  %v3319_v23 = vld [vmem:[#allocation4 + $0x60] ss:$40 sps:$4 sm:$0xff]   ;;  %v3337_v31 = vld [vmem:[#allocation4 + $0x150] ss:$40 sps:$4 sm:$0xff]  }
  0xfc   :  { %2959 = vmatprep.subr.bf16.mxu1 %v395_v28  ;;  %v384_v38 = vpop.f32.mrb[4].mxu0  ;;  %v756_v11 = vsel %vm3710_vm4, %v3247_v10, 0.0  ;;  %v837_v16 = vsel %vm3706_vm3, %v3257_v6, 0.0  ;;  %v3340_v10 = vld [vmem:[#allocation4 + $0x190] ss:$40 sps:$4 sm:$0xff]  }
  0xfd   :  { %v386_v39 = vpop.f32.mrb[5].mxu0  ;;  %v3808_v13 = vpack.c.bf16 %v756_v11, %v755_v12  ;;  %v3820_v22 = vpack.c.bf16 %v838_v15, %v837_v16  ;;  %v3351_v11 = vld [vmem:[#allocation4 + $0x1f4] ss:$40 sps:$4 sm:$0xff]   ;;  %v3346_v12 = vld [vmem:[#allocation4 + $0x1e0] ss:$40 sps:$4 sm:$0xff]  }
  0xfe   :  { %v388_v40 = vpop.f32.mrb[6].mxu0  ;;  %v3354_v6 = vld [vmem:[#allocation4 + $0x234] ss:$40 sps:$4 sm:$0xff]   ;;  %v3357_v15 = vld [vmem:[#allocation4 + $0x244] ss:$40 sps:$4 sm:$0xff]  }
  0xff   :  { %v401_v46 = vpack.c.bf16 %v388_v40, %v384_v38  ;;  %v390_v47 = vpop.f32.mrb[7].mxu0  ;;  %v341_v48 = vpop.f32.mrb[8].mxu1  ;;  %v88_v38 = vadd.s32 8, %v3841_v35  ;;  %v2718_v40 = vld [vmem:[%s3987_s1] ss:$0 sm:$0xff] }
 0x100   :  { %v3770_v50 = vpack.c.bf16 %v390_v47, %v386_v39  ;;  %v343_v51 = vpop.f32.mrb[9].mxu1  ;;  %vm94_vm6 = vcmp.eq.s32.totalorder %v3841_v35, %v2718_v40  ;;  %v3352_v16 = vld [vmem:[#allocation4 + $0x230] ss:$40 sps:$4 sm:$0xff]  }
 0x101   :  { %v345_v56 = vpop.f32.mrb[10].mxu1  ;;  %vm95_vm7 = vcmp.eq.s32.totalorder %v88_v38, %v2718_v40 }
 0x102   :  { %v399_v55 = vpack.c.bf16 %v345_v56, %v341_v48  ;;  %v347_v57 = vpop.f32.mrb[11].mxu1  ;;  %v97_v36 = vsel %vm95_vm7, 1.0, %v3482_v20  ;;  %v3312_v56 = vld [vmem:[#allocation4 + $0x4] ss:$40 sps:$4 sm:$0xff]  }
 0x103   :  { %v400_v59 = vpack.c.bf16 %v347_v57, %v343_v51  ;;  %v96_v51 = vsel %vm94_vm6, 1.0, %v3482_v20  ;;  %v3310_v57 = vld [vmem:[#allocation4] ss:$40 sps:$4 sm:$0xff]  }
 0x105   :  { %2956 = vmatmul.mubr.msk.bf16.vlgmr.msra.gmra.mrb[12].mxu1 %vm174_vm0, %v3772_v54 }
 0x106   :  { %2961 = vmatprep.mubr.msk.bf16.mxu1 %vm174_vm0, %v3682_v61  ;;  %2960 = vmatpush3.bf16.msra.mxu1 %v395_v28  ;;  %v3339_v28 = vld [vmem:[#allocation4 + $0x154] ss:$40 sps:$4 sm:$0xff]  }
 0x107   :  { %2965 = vmatprep.subr.bf16.mxu1 %v396_v32 }
 0x111   :  { %2962 = vmatmul.mubr.msk.bf16.vlgmr.msra.gmra.mrb[12].mxu1 %vm174_vm0, %v3784_v7 }
 0x112   :  { %2966 = vmatpush3.bf16.msra.mxu1 %v396_v32  ;;  %2967 = vmatprep.mubr.msk.bf16.mxu1 %vm174_vm0, %v3690_v5  ;;  %v3345_v32 = vld [vmem:[#allocation4 + $0x1a4] ss:$40 sps:$4 sm:$0xff]  }
 0x113   :  { %2971 = vmatprep.subr.bf16.mxu1 %v397_v24 }
 0x11d   :  { %2968 = vmatmul.mubr.msk.bf16.vlgmr.msra.gmra.mrb[12].mxu1 %vm174_vm0, %v3796_v9 }
 0x11e   :  { %2973 = vmatprep.mubr.msk.bf16.mxu1 %vm174_vm0, %v3702_v17  ;;  %2972 = vmatpush3.bf16.msra.mxu1 %v397_v24  ;;  %v3327_v24 = vld [vmem:[#allocation4 + $0xb4] ss:$40 sps:$4 sm:$0xff]  }
 0x11f   :  { %2977 = vmatprep.subr.bf16.mxu1 %v398_v27 }
 0x129   :  { %2974 = vmatmul.mubr.msk.bf16.vlgmr.msra.gmra.mrb[12].mxu1 %vm174_vm0, %v3808_v13 }
 0x12a   :  { %2978 = vmatpush3.bf16.msra.mxu1 %v398_v27  ;;  %2979 = vmatprep.mubr.msk.bf16.mxu1 %vm174_vm0, %v3718_v29  ;;  %v3331_v27 = vld [vmem:[#allocation4 + $0x100] ss:$40 sps:$4 sm:$0xff]  }
 0x12b   :  { %2983 = vmatprep.subr.bf16.mxu1 %v399_v55 }
 0x135   :  { %2980 = vmatmul.mubr.msk.bf16.vlgmr.msra.gmra.mrb[12].mxu1 %vm174_vm0, %v3820_v22 }
 0x136   :  { %2985 = vmatprep.mubr.msk.bf16.mxu1 %vm174_vm0, %v3704_v19  ;;  %2984 = vmatpush3.bf16.msra.mxu1 %v399_v55  ;;  %v3851_v55 = vpack.c.bf16 %v97_v36, %v96_v51  ;;  %v3369_v51 = vld [vmem:[#allocation4 + $0x74] ss:$40 sps:$4 sm:$0xff]   ;;  %v3367_v36 = vld [vmem:[#allocation4 + $0x70] ss:$40 sps:$4 sm:$0xff]  }
 0x137   :  { %2989 = vmatprep.subr.bf16.mxu1 %v400_v59 }
 0x141   :  { %2986 = vmatmul.mubr.msk.bf16.vlgmr.msra.gmra.mrb[12].mxu1 %vm174_vm0, %v3732_v43 }
 0x142   :  { %2990 = vmatpush3.bf16.msra.mxu1 %v400_v59  ;;  %2991 = vmatprep.mubr.msk.bf16.mxu1 %vm174_vm0, %v3738_v49  ;;  %v3318_v59 = vld [vmem:[#allocation4 + $0x54] ss:$40 sps:$4 sm:$0xff]  }
 0x143   :  { %2995 = vmatprep.subr.bf16.mxu1 %v401_v46 }
 0x14d   :  { %2992 = vmatmul.mubr.msk.bf16.vlgmr.msra.gmra.mrb[12].mxu1 %vm174_vm0, %v3726_v33 }
 0x14e   :  { %2997 = vmatprep.mubr.msk.bf16.mxu1 %vm174_vm0, %v3744_v58  ;;  %2996 = vmatpush3.bf16.msra.mxu1 %v401_v46 }
 0x14f   :  { %1775 = vmatprep.subr.bf16.mxu1 %v3315_v30  ;;  %v3360_v30 = vld [vmem:[#allocation4 + $0xc] ss:$40 sps:$4 sm:$0xff]  }
 0x159   :  { %2998 = vmatmul.mubr.msk.bf16.vlgmr.msra.gmra.mrb[12].mxu1 %vm174_vm0, %v3750_v3 }
 0x15a   :  { %1807 = vmatprep.mubr.bf16.mxu1 %v3473_v1  ;;  %1776 = vmatpush1.bf16.msra.mxu1 %v3313_v21  ;;  %v3355_v21 = vld [vmem:[#allocation4 + $0x240] ss:$40 sps:$4 sm:$0xff]  }
 0x15b   :  { %1777 = vmatprep.subr.bf16.mxu1 %v3321_v37  ;;  %v3363_v37 = vld [vmem:[#allocation4 + $0x24] ss:$40 sps:$4 sm:$0xff]  }
 0x15e   :  { %1778 = vmatpush1.bf16.msra.mxu1 %v3319_v23  ;;  %v1150_v23 = vunpack.c.l.bf16 %v3770_v50 }
 0x15f   :  { %1779 = vmatprep.subr.bf16.mxu1 %v3327_v24 }
 0x162   :  { %1780 = vmatpush1.bf16.msra.mxu1 %v3325_v25  ;;  %v2754_v25 = vld [vmem:[%s3993_s7] ss:$0 sm:$0xff] }
 0x163   :  { %1781 = vmatprep.subr.bf16.mxu1 %v3333_v26 }
 0x166   :  { %1782 = vmatpush1.bf16.msra.mxu1 %v3331_v27 }
 0x167   :  { %1783 = vmatprep.subr.bf16.mxu1 %v3339_v28  ;;  %v1151_v28 = vunpack.c.h.bf16 %v3770_v50  ;;  %v3364_v50 = vld [vmem:[#allocation4 + $0x58] ss:$40 sps:$4 sm:$0xff]  }
 0x16a   :  { %1784 = vmatpush1.bf16.msra.mxu1 %v3337_v31 }
 0x16b   :  { %1785 = vmatprep.subr.bf16.mxu1 %v3345_v32 }
 0x16e   :  { %1786 = vmatpush1.bf16.msra.mxu1 %v3343_v34 }
 0x16f   :  { %1787 = vmatprep.subr.bf16.mxu1 %v3351_v11  ;;  %v3393_v11 = vld [vmem:[#allocation4 + $0x1b4] ss:$40 sps:$4 sm:$0xff]  }
 0x172   :  { %1788 = vmatpush1.bf16.msra.mxu1 %v3349_v14  ;;  %v3391_v14 = vld [vmem:[#allocation4 + $0x1b0] ss:$40 sps:$4 sm:$0xff]  }
 0x173   :  { %1789 = vmatprep.subr.bf16.mxu1 %v3357_v15  ;;  %v3399_v15 = vld [vmem:[#allocation4 + $0x204] ss:$40 sps:$4 sm:$0xff]  }
 0x176   :  { %1790 = vmatpush1.bf16.msra.mxu1 %v3355_v21  ;;  %v3397_v21 = vld [vmem:[#allocation4 + $0x200] ss:$40 sps:$4 sm:$0xff]  }
 0x177   :  { %1861 = vmatprep.subr.bf16.mxu1 %v3363_v37  ;;  %v3405_v37 = vld [vmem:[#allocation4 + $0x254] ss:$40 sps:$4 sm:$0xff]  }
 0x22c   :  { %v2999_v39 = vpop.f32.mrb[12].mxu1 }
 0x22d   :  { %v1128_v44 = vpop.f32.mrb[13].mxu1 }
 0x22e   :  { %v3000_v45 = vpop.f32.mrb[14].mxu1 }
 0x22f   :  { %v1148_v46 = vpack.c.bf16 %v3000_v45, %v2999_v39  ;;  %v1131_v47 = vpop.f32.mrb[15].mxu1  ;;  %v3358_v45 = vld [vmem:[#allocation4 + $0x8] ss:$40 sps:$4 sm:$0xff]  }
 0x230   :  { %v1147_v48 = vpack.c.bf16 %v1131_v47, %v1128_v44 }
 0x232   :  { %3002 = vmatpush3.bf16.msra.mxu0 %v1147_v48  ;;  %v3366_v48 = vld [vmem:[#allocation4 + $0x5c] ss:$40 sps:$4 sm:$0xff]  }
 0x233   :  { %3003 = vmatprep.subr.bf16.mxu0 %v3482_v20 }
 0x236   :  { %3004 = vmatpush3.bf16.msra.mxu0 %v1148_v46  ;;  %v3361_v46 = vld [vmem:[#allocation4 + $0x20] ss:$40 sps:$4 sm:$0xff]  }
 0x237   :  { %1689 = vmatprep.subr.bf16.mxu0 %v3312_v56  ;;  %v3372_v56 = vld [vmem:[#allocation4 + $0xac] ss:$40 sps:$4 sm:$0xff]  }
 0x239   :  { %3006 = vmatmul.mubr.msk.bf16.vlgmr.msra.gmra.mrb[8].mxu0 %vm1152_vm8, %v3851_v55 }
 0x23a   :  { %1690 = vmatpush1.bf16.msra.mxu0 %v3310_v57  ;;  %1721 = vmatprep.mubr.bf16.mxu0 %v3473_v1  ;;  %v3375_v57 = vld [vmem:[#allocation4 + $0xc4] ss:$40 sps:$4 sm:$0xff]  }
 0x23b   :  { %1691 = vmatprep.subr.bf16.mxu0 %v3318_v59  ;;  %v3370_v59 = vld [vmem:[#allocation4 + $0xa8] ss:$40 sps:$4 sm:$0xff]  }
 0x23e   :  { %1692 = vmatpush1.bf16.msra.mxu0 %v3316_v62  ;;  %v3373_v62 = vld [vmem:[#allocation4 + $0xc0] ss:$40 sps:$4 sm:$0xff]  }
 0x23f   :  { %1693 = vmatprep.subr.bf16.mxu0 %v3324_v63  ;;  %v3378_v63 = vld [vmem:[#allocation4 + $0xfc] ss:$40 sps:$4 sm:$0xff]  }
 0x242   :  { %1694 = vmatpush1.bf16.msra.mxu0 %v3322_v0  ;;  %v3381_v0 = vld [vmem:[#allocation4 + $0x114] ss:$40 sps:$4 sm:$0xff]  }
 0x243   :  { %1695 = vmatprep.subr.bf16.mxu0 %v3330_v2  ;;  %v3376_v2 = vld [vmem:[#allocation4 + $0xf8] ss:$40 sps:$4 sm:$0xff]  }
 0x246   :  { %1696 = vmatpush1.bf16.msra.mxu0 %v3328_v41  ;;  %v3379_v41 = vld [vmem:[#allocation4 + $0x110] ss:$40 sps:$4 sm:$0xff]  }
 0x247   :  { %1697 = vmatprep.subr.bf16.mxu0 %v3336_v60  ;;  %v3384_v60 = vld [vmem:[#allocation4 + $0x14c] ss:$40 sps:$4 sm:$0xff]  }
 0x24a   :  { %1698 = vmatpush1.bf16.msra.mxu0 %v3334_v8  ;;  %v3387_v8 = vld [vmem:[#allocation4 + $0x164] ss:$40 sps:$4 sm:$0xff]  }
 0x24b   :  { %1699 = vmatprep.subr.bf16.mxu0 %v3342_v42  ;;  %v3382_v42 = vld [vmem:[#allocation4 + $0x148] ss:$40 sps:$4 sm:$0xff]  }
 0x24e   :  { %1700 = vmatpush1.bf16.msra.mxu0 %v3340_v10  ;;  %v3385_v10 = vld [vmem:[#allocation4 + $0x160] ss:$40 sps:$4 sm:$0xff]  }
 0x24f   :  { %1701 = vmatprep.subr.bf16.mxu0 %v3348_v4  ;;  %v3390_v4 = vld [vmem:[#allocation4 + $0x19c] ss:$40 sps:$4 sm:$0xff]  }
 0x252   :  { %1702 = vmatpush1.bf16.msra.mxu0 %v3346_v12  ;;  %v3388_v12 = vld [vmem:[#allocation4 + $0x198] ss:$40 sps:$4 sm:$0xff]  }
 0x253   :  { %1703 = vmatprep.subr.bf16.mxu0 %v3354_v6  ;;  %v3396_v6 = vld [vmem:[#allocation4 + $0x1ec] ss:$40 sps:$4 sm:$0xff]  }
 0x256   :  { %1704 = vmatpush1.bf16.msra.mxu0 %v3352_v16  ;;  %v3394_v16 = vld [vmem:[#allocation4 + $0x1e8] ss:$40 sps:$4 sm:$0xff]  }
 0x257   :  { %1732 = vmatprep.subr.bf16.mxu0 %v3360_v30  ;;  %v3402_v30 = vld [vmem:[#allocation4 + $0x23c] ss:$40 sps:$4 sm:$0xff]  }
 0x30c   :  { %v1190_v24 = vpop.f32.mrb[8].mxu0 }
 0x30d   :  { %v1191_v26 = vadd.f32 %v1190_v24, %v1150_v23  ;;  %v3007_v27 = vpop.f32.mrb[9].mxu0  ;;  %v3400_v23 = vld [vmem:[#allocation4 + $0x238] ss:$40 sps:$4 sm:$0xff]  }
 0x30e   :  { %v1193_v31 = vpop.f32.mrb[10].mxu0  ;;  %v3403_v24 = vld [vmem:[#allocation4 + $0x250] ss:$40 sps:$4 sm:$0xff]   ;;  %v3411_v27 = vld [vmem:[#allocation4 + $0x6c] ss:$40 sps:$4 sm:$0xff]  }
 0x30f   :  { %v1204_v32 = vadd.f32 %v2754_v25, %v1191_v26  ;;  %v1194_v34 = vadd.f32 %v1193_v31, %v1151_v28  ;;  %v3008_v38 = vpop.f32.mrb[11].mxu0  ;;  %v3406_v26 = vld [vmem:[#allocation4 + $0x18] ss:$40 sps:$4 sm:$0xff]   ;;  %v3409_v28 = vld [vmem:[#allocation4 + $0x68] ss:$40 sps:$4 sm:$0xff]  }
 0x310   :  { %v3414_v31 = vld [vmem:[#allocation4 + $0xbc] ss:$40 sps:$4 sm:$0xff]   ;;  %v3415_v38 = vld [vmem:[#allocation4 + $0x108] ss:$40 sps:$4 sm:$0xff]  }
 0x311   :  { %v1205_v39 = vadd.f32 %v2754_v25, %v1194_v34  ;;  %v1206_v40 = vmax.f32 %v1204_v32, 0.0  ;;  %v3408_v25 = vld [vmem:[#allocation4 + $0x1c] ss:$40 sps:$4 sm:$0xff]   ;;  %v3412_v32 = vld [vmem:[#allocation4 + $0xb8] ss:$40 sps:$4 sm:$0xff]  }
 0x312   :  { %v3417_v34 = vld [vmem:[#allocation4 + $0x10c] ss:$40 sps:$4 sm:$0xff]  }
 0x313   :  { %v1207_v44 = vmax.f32 %v1205_v39, 0.0  ;;  %v3420_v39 = vld [vmem:[#allocation4 + $0x15c] ss:$40 sps:$4 sm:$0xff]  }
 0x315   :  { %v3861_v47 = vpack.c.bf16 %v1207_v44, %v1206_v40  ;;  %v3418_v40 = vld [vmem:[#allocation4 + $0x158] ss:$40 sps:$4 sm:$0xff]   ;;  %v3423_v44 = vld [vmem:[#allocation4 + $0x1ac] ss:$40 sps:$4 sm:$0xff]  }
 0x317   :  { %1722 = vmatmul.mubr.bf16.vlgmr.msra.gmra.mrb[12].mxu0 %v3861_v47  ;;  %1808 = vmatmul.mubr.bf16.vlgmr.msra.gmra.mrb[16].mxu1 %v3861_v47 }
 0x318   :  { %1733 = vmatpush1.bf16.msra.mxu0 %v3358_v45  ;;  %1862 = vmatpush1.bf16.msra.mxu1 %v3361_v46  ;;  %v3421_v45 = vld [vmem:[#allocation4 + $0x1a8] ss:$40 sps:$4 sm:$0xff]   ;;  %v3424_v46 = vld [vmem:[#allocation4 + $0x1f8] ss:$40 sps:$4 sm:$0xff]  }
 0x319   :  { %1734 = vmatprep.subr.bf16.mxu0 %v3366_v48  ;;  %1863 = vmatprep.subr.bf16.mxu1 %v3369_v51  ;;  %v3429_v48 = vld [vmem:[#allocation4 + $0x24c] ss:$40 sps:$4 sm:$0xff]   ;;  %v3427_v51 = vld [vmem:[#allocation4 + $0x248] ss:$40 sps:$4 sm:$0xff]  }
 0x31a   :  { %1764 = vmatprep.mubr.bf16.mxu0 %v3473_v1  ;;  %1893 = vmatprep.mubr.bf16.mxu1 %v3473_v1 }
 0x31c   :  { %1735 = vmatpush1.bf16.msra.mxu0 %v3364_v50  ;;  %1864 = vmatpush1.bf16.msra.mxu1 %v3367_v36 }
 0x31d   :  { %1736 = vmatprep.subr.bf16.mxu0 %v3372_v56  ;;  %1865 = vmatprep.subr.bf16.mxu1 %v3375_v57 }
 0x320   :  { %1737 = vmatpush1.bf16.msra.mxu0 %v3370_v59  ;;  %1866 = vmatpush1.bf16.msra.mxu1 %v3373_v62 }
 0x321   :  { %1738 = vmatprep.subr.bf16.mxu0 %v3378_v63  ;;  %1867 = vmatprep.subr.bf16.mxu1 %v3381_v0 }
 0x324   :  { %1739 = vmatpush1.bf16.msra.mxu0 %v3376_v2  ;;  %1868 = vmatpush1.bf16.msra.mxu1 %v3379_v41 }
 0x325   :  { %1740 = vmatprep.subr.bf16.mxu0 %v3384_v60  ;;  %1869 = vmatprep.subr.bf16.mxu1 %v3387_v8 }
 0x328   :  { %1741 = vmatpush1.bf16.msra.mxu0 %v3382_v42  ;;  %1870 = vmatpush1.bf16.msra.mxu1 %v3385_v10 }
 0x329   :  { %1742 = vmatprep.subr.bf16.mxu0 %v3390_v4  ;;  %1871 = vmatprep.subr.bf16.mxu1 %v3393_v11 }
 0x32c   :  { %1743 = vmatpush1.bf16.msra.mxu0 %v3388_v12  ;;  %1872 = vmatpush1.bf16.msra.mxu1 %v3391_v14 }
 0x32d   :  { %1744 = vmatprep.subr.bf16.mxu0 %v3396_v6  ;;  %1873 = vmatprep.subr.bf16.mxu1 %v3399_v15 }
 0x330   :  { %1745 = vmatpush1.bf16.msra.mxu0 %v3394_v16  ;;  %1874 = vmatpush1.bf16.msra.mxu1 %v3397_v21 }
 0x331   :  { %1746 = vmatprep.subr.bf16.mxu0 %v3402_v30  ;;  %1875 = vmatprep.subr.bf16.mxu1 %v3405_v37 }
 0x334   :  { %1747 = vmatpush1.bf16.msra.mxu0 %v3400_v23  ;;  %1876 = vmatpush1.bf16.msra.mxu1 %v3403_v24 }
 0x335   :  { %1818 = vmatprep.subr.bf16.mxu0 %v3408_v25  ;;  %3063 = vmatprep.subr.bf16.mxu1 %v3482_v20 }
 0x337   :  { %1765 = vmatmul.mubr.bf16.vlgmr.msra.gmra.mrb[16].mxu0 %v3861_v47  ;;  %1894 = vmatmul.mubr.bf16.vlgmr.msra.gmra.mrb[20].mxu1 %v3861_v47 }
 0x338   :  { %1819 = vmatpush1.bf16.msra.mxu0 %v3406_v26  ;;  %1850 = vmatprep.mubr.bf16.mxu0 %v3473_v1  ;;  %v3426_v1 = vld [vmem:[#allocation4 + $0x1fc] ss:$40 sps:$4 sm:$0xff]  }
 0x339   :  { %1820 = vmatprep.subr.bf16.mxu0 %v3411_v27  ;;  %3067 = vmatprep.mubr.msk.bf16.mxu1 %vm3483_vm5, %v3482_v20 }
 0x33c   :  { %1821 = vmatpush1.bf16.msra.mxu0 %v3409_v28 }
 0x33d   :  { %1822 = vmatprep.subr.bf16.mxu0 %v3414_v31 }
 0x340   :  { %1823 = vmatpush1.bf16.msra.mxu0 %v3412_v32 }
 0x341   :  { %1824 = vmatprep.subr.bf16.mxu0 %v3417_v34  ;;  %v3430_v34 = vld [vmem:[%s3996_s10] sm:$0xff]  }
 0x344   :  { %1825 = vmatpush1.bf16.msra.mxu0 %v3415_v38  ;;  %v3432_v38 = vld [vmem:[%s3996_s10 + $0x10] sm:$0xff]  }
 0x345   :  { %1826 = vmatprep.subr.bf16.mxu0 %v3420_v39  ;;  %v3433_v39 = vld [vmem:[%s3996_s10 + $0x18] sm:$0xff]  }
 0x348   :  { %1827 = vmatpush1.bf16.msra.mxu0 %v3418_v40  ;;  %v3434_v40 = vld [vmem:[%s3996_s10 + $0x20] sm:$0xff]  }
 0x349   :  { %1828 = vmatprep.subr.bf16.mxu0 %v3423_v44  ;;  %v3435_v44 = vld [vmem:[%s3996_s10 + $0x28] sm:$0xff]  }
 0x34c   :  { %1829 = vmatpush1.bf16.msra.mxu0 %v3421_v45  ;;  %v3436_v45 = vld [vmem:[%s3996_s10 + $0x30] sm:$0xff]  }
 0x34d   :  { %1830 = vmatprep.subr.bf16.mxu0 %v3426_v1  ;;  %v3437_v1 = vld [vmem:[%s3996_s10 + $0x38] sm:$0xff]  }
 0x350   :  { %1831 = vmatpush1.bf16.msra.mxu0 %v3424_v46  ;;  %v3438_v46 = vld [vmem:[%s3998_s12] sm:$0xff]  }
 0x351   :  { %1832 = vmatprep.subr.bf16.mxu0 %v3429_v48  ;;  %v3439_v48 = vld [vmem:[%s3998_s12 + $0x8] sm:$0xff]  }
 0x354   :  { %1833 = vmatpush1.bf16.msra.mxu0 %v3427_v51 }
 0x357   :  { %1851 = vmatmul.mubr.bf16.vlgmr.msra.gmra.mrb[20].mxu0 %v3861_v47 }
 0x358   :  { %3011 = vmatprep.mubr.msk.bf16.mxu0 %vm174_vm0, %v3668_v52 }
 0x3ea   :  { %v1723_v50 = vpop.f32.mrb[12].mxu0  ;;  %v1809_v36 = vpop.f32.mrb[16].mxu1 }
 0x3eb   :  { %v1725_v56 = vpop.f32.mrb[13].mxu0  ;;  %v1811_v57 = vpop.f32.mrb[17].mxu1 }
 0x3ec   :  { %v1727_v59 = vpop.f32.mrb[14].mxu0  ;;  %v1813_v62 = vpop.f32.mrb[18].mxu1 }
 0x3ed   :  { %v1904_v63 = vpack.c.bf16 %v1727_v59, %v1723_v50  ;;  %v1908_v0 = vpack.c.bf16 %v1813_v62, %v1809_v36  ;;  %v1729_v2 = vpop.f32.mrb[15].mxu0  ;;  %v1815_v41 = vpop.f32.mrb[19].mxu1 }
 0x3ee   :  { %v1905_v60 = vpack.c.bf16 %v1729_v2, %v1725_v56  ;;  %v1909_v8 = vpack.c.bf16 %v1815_v41, %v1811_v57  ;;  %v2856_v2 = vld [vmem:[%s3997_s11] ss:$0 sm:$0xff] }
 0x3f0   :  { %3009 = vmatprep.subr.bf16.mxu0 %v1905_v60 }
 0x3f1   :  { %3010 = vmatpush3.bf16.msra.mxu0 %v1905_v60 }
 0x3f2   :  { %3015 = vmatprep.subr.bf16.mxu0 %v1904_v63 }
 0x3f4   :  { %3012 = vmatmul.mubr.msk.bf16.vlgmr.msra.gmra.mrb[24].mxu0 %vm174_vm0, %v3758_v18 }
 0x3f5   :  { %3016 = vmatpush3.bf16.msra.mxu0 %v1904_v63  ;;  %3017 = vmatprep.mubr.msk.bf16.mxu0 %vm174_vm0, %v3670_v53  ;;  %v3440_v63 = vld [vmem:[%s3998_s12 + $0x10] sm:$0xff]  }
 0x400   :  { %3018 = vmatmul.mubr.msk.bf16.vlgmr.msra.gmra.mrb[24].mxu0 %vm174_vm0, %v3772_v54 }
 0x401   :  { %3023 = vmatprep.mubr.msk.bf16.mxu0 %vm174_vm0, %v3682_v61 }
 0x40a   :  { %v1766_v52 = vpop.f32.mrb[16].mxu0  ;;  %v1895_v47 = vpop.f32.mrb[20].mxu1 }
 0x40b   :  { %v1768_v42 = vpop.f32.mrb[17].mxu0  ;;  %v1897_v10 = vpop.f32.mrb[21].mxu1 }
 0x40c   :  { %v1770_v4 = vpop.f32.mrb[18].mxu0  ;;  %v1899_v11 = vpop.f32.mrb[22].mxu1 }
 0x40d   :  { %v1906_v12 = vpack.c.bf16 %v1770_v4, %v1766_v52  ;;  %v1912_v14 = vpack.c.bf16 %v1899_v11, %v1895_v47  ;;  %v1772_v6 = vpop.f32.mrb[19].mxu0  ;;  %v1901_v18 = vpop.f32.mrb[23].mxu1  ;;  %v2865_v4 = vld [vmem:[#allocation3] ss:$0 sm:$0xff] }
 0x40e   :  { %v1907_v15 = vpack.c.bf16 %v1772_v6, %v1768_v42  ;;  %v1913_v16 = vpack.c.bf16 %v1901_v18, %v1897_v10 }
 0x40f   :  { %3021 = vmatprep.subr.bf16.mxu0 %v1906_v12 }
 0x410   :  { %3022 = vmatpush3.bf16.msra.mxu0 %v1906_v12  ;;  %v2406_v37 = vunpack.c.h.bf16 %v1913_v16 }
 0x411   :  { %3027 = vmatprep.subr.bf16.mxu0 %v1907_v15 }
 0x413   :  { %3024 = vmatmul.mubr.msk.bf16.vlgmr.msra.gmra.mrb[24].mxu0 %vm174_vm0, %v3784_v7 }
 0x414   :  { %3028 = vmatpush3.bf16.msra.mxu0 %v1907_v15  ;;  %3029 = vmatprep.mubr.msk.bf16.mxu0 %vm174_vm0, %v3690_v5 }
 0x415   :  { %3033 = vmatprep.subr.bf16.mxu0 %v1908_v0 }
 0x41f   :  { %3030 = vmatmul.mubr.msk.bf16.vlgmr.msra.gmra.mrb[24].mxu0 %vm174_vm0, %v3796_v9 }
 0x420   :  { %3034 = vmatpush3.bf16.msra.mxu0 %v1908_v0  ;;  %3035 = vmatprep.mubr.msk.bf16.mxu0 %vm174_vm0, %v3702_v17  ;;  %v3441_v0 = vld [vmem:[%s3998_s12 + $0x18] sm:$0xff]  }
 0x421   :  { %3039 = vmatprep.subr.bf16.mxu0 %v1909_v8 }
 0x42a   :  { %v1852_v53 = vpop.f32.mrb[20].mxu0 }
 0x42b   :  { %v1854_v61 = vpop.f32.mrb[21].mxu0  ;;  %3036 = vmatmul.mubr.msk.bf16.vlgmr.msra.gmra.mrb[24].mxu0 %vm174_vm0, %v3808_v13 }
 0x42c   :  { %3040 = vmatpush3.bf16.msra.mxu0 %v1909_v8  ;;  %v1856_v54 = vpop.f32.mrb[22].mxu0  ;;  %3041 = vmatprep.mubr.msk.bf16.mxu0 %vm174_vm0, %v3718_v29 }
 0x42d   :  { %v1910_v5 = vpack.c.bf16 %v1856_v54, %v1852_v53  ;;  %v1858_v7 = vpop.f32.mrb[23].mxu0 }
 0x42e   :  { %v1911_v21 = vpack.c.bf16 %v1858_v7, %v1854_v61 }
 0x42f   :  { %3045 = vmatprep.subr.bf16.mxu0 %v1910_v5 }
 0x437   :  { %3042 = vmatmul.mubr.msk.bf16.vlgmr.msra.gmra.mrb[24].mxu0 %vm174_vm0, %v3820_v22 }
 0x438   :  { %3046 = vmatpush3.bf16.msra.mxu0 %v1910_v5  ;;  %3047 = vmatprep.mubr.msk.bf16.mxu0 %vm174_vm0, %v3704_v19 }
 0x439   :  { %3051 = vmatprep.subr.bf16.mxu0 %v1911_v21 }
 0x443   :  { %3048 = vmatmul.mubr.msk.bf16.vlgmr.msra.gmra.mrb[24].mxu0 %vm174_vm0, %v3732_v43 }
 0x444   :  { %3052 = vmatpush3.bf16.msra.mxu0 %v1911_v21  ;;  %3053 = vmatprep.mubr.msk.bf16.mxu0 %vm174_vm0, %v3738_v49 }
 0x445   :  { %3057 = vmatprep.subr.bf16.mxu0 %v1912_v14 }
 0x44f   :  { %3054 = vmatmul.mubr.msk.bf16.vlgmr.msra.gmra.mrb[24].mxu0 %vm174_vm0, %v3726_v33  ;;  %v2501_v33 = vld [vmem:[%s3989_s3] sm:$0x3] }
 0x450   :  { %3058 = vmatpush3.bf16.msra.mxu0 %v1912_v14  ;;  %3059 = vmatprep.mubr.msk.bf16.mxu0 %vm174_vm0, %v3744_v58  ;;  %v2405_v58 = vunpack.c.l.bf16 %v1913_v16 }
 0x451   :  { %3097 = vmatprep.subr.bf16.mxu0 %v3482_v20  ;;  %2504 = vperm.xlu0 %3294, %v2501_v33  }
 0x45b   :  { %3060 = vmatmul.mubr.msk.bf16.vlgmr.msra.gmra.mrb[24].mxu0 %vm174_vm0, %v3750_v3  ;;  %v2719_v3 = vld [vmem:[%s3988_s2] ss:$0 sm:$0xff] }
 0x45c   :  { %3105 = vmatprep.mubr.msk.bf16.mxu0 %vm3483_vm5, %v3482_v20  ;;  %vm104_vm9 = vcmp.eq.s32.totalorder %v3841_v35, %v2719_v3  ;;  %v3431_v35 = vld [vmem:[%s3996_s10 + $0x8] sm:$0xff]   ;;  %3098 = vmatpush3.bf16.msra.mxu0 %v3438_v46 }
 0x45d   :  { %v105_v28 = vsel %vm104_vm9, 1.0, %v3482_v20  ;;  %3099 = vmatprep.subr.bf16.mxu0 %v3482_v20 }
 0x45e   :  { %v106_v32 = vpack.c.bf16 %v105_v28, %v105_v28 }
 0x460   :  { %3100 = vmatpush3.bf16.msra.mxu0 %v3439_v48 }
 0x461   :  { %3101 = vmatprep.subr.bf16.mxu0 %v3482_v20 }
 0x464   :  { %3102 = vmatpush3.bf16.msra.mxu0 %v3440_v63 }
 0x465   :  { %3103 = vmatprep.subr.bf16.mxu0 %v3482_v20 }
 0x468   :  { %3104 = vmatpush3.bf16.msra.mxu0 %v3441_v0 }
 0x4d0   :  { %v2505_v51 = vpop.permute.xlu0 %2504 }
 0x52e   :  { %v3061_v17 = vpop.f32.mrb[24].mxu0 }
 0x52f   :  { %v2383_v19 = vpop.f32.mrb[25].mxu0 }
 0x530   :  { %v3062_v29 = vpop.f32.mrb[26].mxu0 }
 0x531   :  { %v2403_v43 = vpack.c.bf16 %v3062_v29, %v3061_v17  ;;  %v2386_v49 = vpop.f32.mrb[27].mxu0 }
 0x532   :  { %v2402_v9 = vpack.c.bf16 %v2386_v49, %v2383_v19 }
 0x534   :  { %3064 = vmatpush3.bf16.msra.mxu1 %v2402_v9 }
 0x535   :  { %3065 = vmatprep.subr.bf16.mxu1 %v3482_v20 }
 0x538   :  { %3066 = vmatpush3.bf16.msra.mxu1 %v2403_v43 }
 0x539   :  { %3071 = vmatprep.subr.bf16.mxu1 %v3482_v20 }
 0x53b   :  { %3068 = vmatmul.mubr.msk.bf16.vlgmr.msra.gmra.mrb[24].mxu1 %vm1152_vm8, %v3851_v55  ;;  %v2854_v55 = vld [vmem:[%s3995_s9] ss:$0 sm:$0xff] }
 0x53c   :  { %3073 = vmatprep.mubr.msk.bf16.mxu1 %vm3483_vm5, %v3482_v20 }
 0x60e   :  { %v2441_v13 = vpop.f32.mrb[24].mxu1 }
 0x60f   :  { %v2442_v22 = vadd.f32 %v2441_v13, %v2405_v58  ;;  %v3069_v30 = vpop.f32.mrb[25].mxu1 }
 0x610   :  { %v2444_v23 = vpop.f32.mrb[26].mxu1 }
 0x611   :  { %v2445_v24 = vadd.f32 %v2444_v23, %v2406_v37  ;;  %v3070_v25 = vpop.f32.mrb[27].mxu1  ;;  %v2455_v26 = vadd.f32 %v2854_v55, %v2442_v22 }
 0x613   :  { %v2456_v27 = vadd.f32 %v2854_v55, %v2445_v24 }
 0x615   :  { %v2457_v31 = vpack.c.bf16 %v2456_v27, %v2455_v26 }
 0x617   :  { %3072 = vmatpush3.bf16.msra.mxu1 %v2457_v31 }
 0x618   :  { %3077 = vmatprep.subr.bf16.mxu1 %v3482_v20 }
 0x61a   :  { %3074 = vmatmul.mubr.msk.bf16.vlgmr.msra.gmra.mrb[28].mxu1 %vm174_vm0, %v106_v32 }
 0x61b   :  { %3078 = vmatpush3.bf16.msra.mxu1 %v3430_v34  ;;  %3093 = vmatprep.mubr.msk.bf16.mxu1 %vm3483_vm5, %v3482_v20 }
 0x61c   :  { %3079 = vmatprep.subr.bf16.mxu1 %v3482_v20 }
 0x61f   :  { %3080 = vmatpush3.bf16.msra.mxu1 %v3431_v35 }
 0x620   :  { %3081 = vmatprep.subr.bf16.mxu1 %v3482_v20 }
 0x623   :  { %3082 = vmatpush3.bf16.msra.mxu1 %v3432_v38 }
 0x624   :  { %3083 = vmatprep.subr.bf16.mxu1 %v3482_v20 }
 0x627   :  { %3084 = vmatpush3.bf16.msra.mxu1 %v3433_v39 }
 0x628   :  { %3085 = vmatprep.subr.bf16.mxu1 %v3482_v20 }
 0x62b   :  { %3086 = vmatpush3.bf16.msra.mxu1 %v3434_v40 }
 0x62c   :  { %3087 = vmatprep.subr.bf16.mxu1 %v3482_v20 }
 0x62f   :  { %3088 = vmatpush3.bf16.msra.mxu1 %v3435_v44 }
 0x630   :  { %3089 = vmatprep.subr.bf16.mxu1 %v3482_v20 }
 0x633   :  { %3090 = vmatpush3.bf16.msra.mxu1 %v3436_v45 }
 0x634   :  { %3091 = vmatprep.subr.bf16.mxu1 %v3482_v20 }
 0x637   :  { %3092 = vmatpush3.bf16.msra.mxu1 %v3437_v1 }
 0x6ed   :  { %v2495_v50 = vpop.f32.mrb[28].mxu1 }
 0x6ee   :  { %v2507_v36 = vmul.f32 %v2505_v51, %v2495_v50  ;;  %v3075_v56 = vpop.f32.mrb[29].mxu1 }
 0x6ef   :  { %v2498_v57 = vpop.f32.mrb[30].mxu1 }
 0x6f0   :  { %v2508_v59 = vpack.c.bf16 %v2507_v36, %v2507_v36  ;;  %v3076_v62 = vpop.f32.mrb[31].mxu1 }
 0x6f2   :  { %3094 = vmatmul.mubr.bf16.vlgmr.msra.gmra.mrb[32].mxu1 %v2508_v59 }
 0x7c5   :  { %v2614_v41 = vpop.f32.mrb[32].mxu1 }
 0x7c6   :  { %v2615_v60 = vadd.f32 %v2856_v2, %v2614_v41  ;;  %v3095_v8 = vpop.f32.mrb[33].mxu1 }
 0x7c7   :  { %v2617_v52 = vpop.f32.mrb[34].mxu1 }
 0x7c8   :  { %v2620_v47 = vmax.f32 %v2615_v60, 0.0  ;;  %v3096_v42 = vpop.f32.mrb[35].mxu1 }
 0x7ca   :  { %v2621_v10 = vpack.c.bf16 %v2620_v47, %v2620_v47 }
 0x7cc   :  { %3106 = vmatmul.mubr.msk.bf16.vlgmr.msra.gmra.mrb[28].mxu0 %vm2661_vm10, %v2621_v10 }
 0x89f   :  { %v2699_v20 = vpop.f32.mrb[28].mxu0 }
 0x8a0   :  { %v2700_v11 = vadd.f32 %v2865_v4, %v2699_v20  ;;  %v3107_v12 = vpop.f32.mrb[29].mxu0 }
 0x8a1   :  { %v2702_v14 = vpop.f32.mrb[30].mxu0 }
 0x8a2   :  { %v2705_v6 = vsub.f32 0.0, %v2700_v11  ;;  %v3108_v18 = vpop.f32.mrb[31].mxu0 }
 0x8a4   :  { %v2706_v15 = vmul.f32 1.442695, %v2705_v6 }
 0x8a6   :  { %3442 = vpow2.f32 %v2706_v15 }
 0x8b0   :  { %v3443_v16 = vpop.eup %3442 }
 0x8b1   :  { %v2708_v53 = vadd.f32 1.0, %v3443_v16 }
 0x8b3   :  { %3444 = vrcp.f32 %v2708_v53 }
 0x8bd   :  { %v3445_v61 = vpop.eup %3444 }
 0x8be   :  { %2712 = vst.msk [vmem:[%s4000_s14] sm:$0x3] %vm2711_vm11, %v3445_v61 }
 0x8bf   :  { %2717 = vsyncpa [#allocation5], 1 }

</bundles_post_ra>
